<compile_context>
chip_gen: v6e
topology: v6e:2x2x1
jax: 0.10.0
libtpu: 0.0.40
codegen_flags: <defaults>
</compile_context>

<pallas_src>
import math
from functools import partial

import jax
import jax.numpy as jnp
from jax.experimental import pallas as pl
from jax.experimental.pallas import tpu as pltpu


_LANE = 128
_SUBLANE = 8
_VMEM_LIMIT_BYTES = 48 * 1024 * 1024   # explicit scoped-VMEM cap (safe on v5e/v6e/v7x)
_VMEM_ACT_BUDGET = 30 * 1024 * 1024    # budget used to derive the row tile tm
_MAX_TM = 2048                         # review-suggested upper bound for the row tile


def _round_up(v, mult):
    return ((v + mult - 1) // mult) * mult


def _pick_tn(cp):
    """Cout-slab width: multiple of 128, divides cp, at most 512 (lane-dense stores)."""
    if cp <= 512:
        return cp
    for k in range(512 // _LANE, 0, -1):
        cand = _LANE * k
        if cp % cand == 0:
            return cand
    return _LANE


def _pick_tm(m, cin, tn, n_tasks, has_task_inputs, itemsize):
    """Largest row tile that keeps the per-step working set inside the VMEM budget."""
    n_in = 1 + (n_tasks if has_task_inputs else 0)   # activation inputs per row
    n_out = 1 + n_tasks                              # pretrained + per-task outputs
    # double-buffered activation/output tiles + ~4 f32 intermediates of width tn per row
    per_row = 2 * itemsize * (cin * n_in + tn * n_out) + 4 * 4 * tn
    # weight-like operands (conv-weight slab, per-task dW slab, bias slab), double-buffered
    weight_bytes = 2 * itemsize * (cin * tn * (1 + n_tasks)) + 2 * 4 * tn
    tm = (_VMEM_ACT_BUDGET - weight_bytes) // max(per_row, 1)
    tm = max(_SUBLANE, min(int(tm), _MAX_TM))
    tm = (tm // _SUBLANE) * _SUBLANE
    m8 = _round_up(m, _SUBLANE)
    if tm >= m8:
        if m8 > 1024:
            # keep >= 2 row tiles so the parallel grid can still split across
            # v7x's two TensorCores
            tm = _round_up((m8 + 1) // 2, _SUBLANE)
        else:
            tm = m8
    return tm


# ----------------------------- kernels -------------------------------------


def _mtlora_kernel_per_task_inputs(x_ref, xt_ref, w_ref, b_ref, dw_ref,
                                   pre_ref, task_ref):
    """One (M-tile, Cout-slab) step; distinct per-task inputs.

    x_ref   : (TM, Cin)        shared input tile
    xt_ref  : (T, TM, Cin)     per-task input tiles
    w_ref   : (Cin, TN)        frozen conv weight slab (transposed, Cout-padded)
    b_ref   : (1, TN)          conv bias slab (f32)
    dw_ref  : (T, Cin, TN)     per-task dense LoRA delta-weight slab (scale folded in)
    pre_ref : (TM, TN)         pretrained output tile
    task_ref: (T, TM, TN)      per-task output tiles
    """
    bias = b_ref[...]                                               # (1, TN) f32
    pre = jnp.dot(x_ref[...], w_ref[...],
                  preferred_element_type=jnp.float32) + bias        # (TM, TN) f32
    pre_ref[...] = pre.astype(pre_ref.dtype)
    # Bias is added again on the LoRA conv branch (matches PyTorch forward);
    # hoist it out of the task loop.
    pre2b = pre + bias
    for t in range(task_ref.shape[0]):                              # small static loop
        delta = jnp.dot(xt_ref[t], dw_ref[t],
                        preferred_element_type=jnp.float32)
        task_ref[t] = (pre2b + delta).astype(task_ref.dtype)


def _mtlora_kernel_shared_input(x_ref, w_ref, b_ref, dw_ref, pre_ref, task_ref):
    """Same as above but x_tasks is None: reuse the shared x tile for every task
    (avoids DMAing the input (T+1) times)."""
    x = x_ref[...]
    bias = b_ref[...]
    pre = jnp.dot(x, w_ref[...], preferred_element_type=jnp.float32) + bias
    pre_ref[...] = pre.astype(pre_ref.dtype)
    pre2b = pre + bias
    for t in range(task_ref.shape[0]):
        delta = jnp.dot(x, dw_ref[t], preferred_element_type=jnp.float32)
        task_ref[t] = (pre2b + delta).astype(task_ref.dtype)


# ----------------------------- wrapper --------------------------------------


def mtlora_conv_forward(x_nchw, x_tasks, params, tasks):
    """Forward pass of MTLoRAConv (matrix mode, k=1, groups=1).

    Returns (pretrained_nchw, {task: out_nchw}), matching the PyTorch module.
    """
    n, cin, h, w = x_nchw.shape
    cout = params["conv_w"].shape[0]
    dtype = x_nchw.dtype
    itemsize = jnp.dtype(dtype).itemsize
    n_tasks = len(tasks)
    m = n * h * w

    cp = _round_up(cout, _LANE)          # padded Cout (lane-dense outputs)
    tn = _pick_tn(cp)
    n_steps = cp // tn

    has_task_inputs = x_tasks is not None
    tm = _pick_tm(m, cin, tn, n_tasks, has_task_inputs, itemsize)
    m_pad = _round_up(m, tm)
    m_steps = m_pad // tm

    # ---- glue: layout + parameter prep (plain JAX; fuses with surrounding graph) ----
    def flatten(a):  # NCHW -> (M_pad, Cin)
        a = jnp.transpose(a, (0, 2, 3, 1)).reshape(m, cin).astype(dtype)
        return jnp.pad(a, ((0, m_pad - m), (0, 0)))

    x_flat = flatten(x_nchw)

    w_mat = jnp.pad(params["conv_w"].reshape(cout, cin).T,
                    ((0, 0), (0, cp - cout))).astype(dtype)              # (Cin, Cp)
    bias = jnp.pad(params["conv_b"].astype(jnp.float32),
                   (0, cp - cout)).reshape(1, cp)                        # (1, Cp) f32
    # Dense per-task delta weight: dW_t = A_t^T @ (scale_t * B_t)^T, shape (Cin, Cout)
    dw = jnp.stack(
        [jnp.pad(params["lora_tasks_A"][t].T
                 @ (params["lora_task_scale"][t] * params["lora_tasks_B"][t]).T,
                 ((0, 0), (0, cp - cout)))
         for t in tasks], axis=0).astype(dtype)                          # (T, Cin, Cp)

    # Grid: (Cout-slab j  [outer],  M-tile i  [inner]) so weight slabs are only
    # re-fetched when j changes while activation tiles stream along i.
    x_spec = pl.BlockSpec((tm, cin), lambda j, i: (i, 0))
    w_spec = pl.BlockSpec((cin, tn), lambda j, i: (0, j))
    b_spec = pl.BlockSpec((1, tn), lambda j, i: (0, j))
    dw_spec = pl.BlockSpec((n_tasks, cin, tn), lambda j, i: (0, 0, j))
    pre_spec = pl.BlockSpec((tm, tn), lambda j, i: (i, j))
    task_spec = pl.BlockSpec((n_tasks, tm, tn), lambda j, i: (0, i, j))

    out_shape = (jax.ShapeDtypeStruct((m_pad, cp), dtype),
                 jax.ShapeDtypeStruct((n_tasks, m_pad, cp), dtype))
    compiler_params = pltpu.CompilerParams(
        dimension_semantics=("parallel", "parallel"),
        vmem_limit_bytes=_VMEM_LIMIT_BYTES,
    )

    if has_task_inputs:
        xt_stack = jnp.stack([flatten(x_tasks[t]) for t in tasks], axis=0)  # (T, M_pad, Cin)
        xt_spec = pl.BlockSpec((n_tasks, tm, cin), lambda j, i: (0, i, 0))
        pre_flat, task_flat = pl.pallas_call(
            _mtlora_kernel_per_task_inputs,
            out_shape=out_shape,
            grid_spec=pltpu.PrefetchScalarGridSpec(
                num_scalar_prefetch=0,
                grid=(n_steps, m_steps),
                in_specs=[x_spec, xt_spec, w_spec, b_spec, dw_spec],
                out_specs=[pre_spec, task_spec],
            ),
            compiler_params=compiler_params,
        )(x_flat, xt_stack, w_mat, bias, dw)
    else:
        pre_flat, task_flat = pl.pallas_call(
            _mtlora_kernel_shared_input,
            out_shape=out_shape,
            grid_spec=pltpu.PrefetchScalarGridSpec(
                num_scalar_prefetch=0,
                grid=(n_steps, m_steps),
                in_specs=[x_spec, w_spec, b_spec, dw_spec],
                out_specs=[pre_spec, task_spec],
            ),
            compiler_params=compiler_params,
        )(x_flat, w_mat, bias, dw)

    def unflatten(a):  # (M_pad, Cp) -> NCHW (strip row/Cout padding)
        a = a[:m, :cout]
        return jnp.transpose(a.reshape(n, h, w, cout), (0, 3, 1, 2))

    pretrained = unflatten(pre_flat)
    lora_tasks = {t: unflatten(task_flat[i]) for i, t in enumerate(tasks)}
    return pretrained, lora_tasks


# ----------------------------- reference & demo ------------------------------


def _reference_forward(x_nchw, x_tasks, params, tasks):
    """Pure-jnp reference mirroring the PyTorch forward (matrix mode, k=1)."""
    cout, cin = params["conv_w"].shape[:2]
    w2d = params["conv_w"].reshape(cout, cin)
    b = params["conv_b"]

    def conv1x1(inp, weight2d):
        return jnp.einsum("nchw,oc->nohw", inp, weight2d) + b[None, :, None, None]

    pretrained = conv1x1(x_nchw, w2d)
    lora_tasks = {}
    for t in tasks:
        dw = (params["lora_tasks_B"][t] @ params["lora_tasks_A"][t]) * params["lora_task_scale"][t]
        xt = x_nchw if x_tasks is None else x_tasks[t]
        lora_tasks[t] = pretrained + conv1x1(xt, dw)
    return pretrained, lora_tasks


if __name__ == "__main__":
    # Module config (MTLoRAConv defaults): kernel_size=1, groups=1, bias=True,
    # use_norm=False, use_act=False, shared_mode='matrix', lora_dropout=0.0.
    N, CIN, H, W = 2, 4, 16, 16
    COUT = 8
    R = 4
    TASKS = ("seg", "depth")

    key = jax.random.PRNGKey(0)
    keys = jax.random.split(key, 12)

    # Deterministic synthetic parameters.  NOTE: the real module zero-inits the
    # LoRA B matrices; small random values are used so the LoRA path is exercised.
    params = {
        "conv_w": jax.random.normal(keys[0], (COUT, CIN, 1, 1), jnp.float32) * 0.2,
        "conv_b": jax.random.normal(keys[1], (COUT,), jnp.float32) * 0.1,
        # lora_shared_A/B exist in the module but their conv output is never
        # returned in 'matrix' mode, so they are dead compute and omitted.
        "lora_tasks_A": {
            "seg": jax.random.uniform(keys[2], (R, CIN), jnp.float32,
                                      -1.0 / math.sqrt(CIN), 1.0 / math.sqrt(CIN)),
            "depth": jax.random.uniform(keys[3], (R, CIN), jnp.float32,
                                        -1.0 / math.sqrt(CIN), 1.0 / math.sqrt(CIN)),
        },
        "lora_tasks_B": {
            "seg": jax.random.normal(keys[4], (COUT, R), jnp.float32) * 0.05,
            "depth": jax.random.normal(keys[5], (COUT, R), jnp.float32) * 0.05,
        },
        "lora_task_scale": {"seg": 1.0, "depth": 0.5},
    }

    x = jax.random.normal(keys[6], (N, CIN, H, W), jnp.float32)
    x_tasks = {
        "seg": jax.random.normal(keys[7], (N, CIN, H, W), jnp.float32),
        "depth": jax.random.normal(keys[8], (N, CIN, H, W), jnp.float32),
    }

    fwd = jax.jit(partial(mtlora_conv_forward, tasks=TASKS))

    # 1) distinct per-task inputs
    pretrained, lora_tasks = fwd(x, x_tasks, params)
    jax.block_until_ready(pretrained)
    for t in TASKS:
        jax.block_until_ready(lora_tasks[t])

    pre_ref, tasks_ref = _reference_forward(x, x_tasks, params, TASKS)
    assert jnp.allclose(pretrained, pre_ref, atol=1e-4, rtol=1e-4)
    for t in TASKS:
        assert jnp.allclose(lora_tasks[t], tasks_ref[t], atol=1e-4, rtol=1e-4)

    # 2) shared input (x_tasks=None) — exercises the no-duplicate-DMA kernel variant
    pre_s, tasks_s = fwd(x, None, params)
    jax.block_until_ready(pre_s)
    for t in TASKS:
        jax.block_until_ready(tasks_s[t])

    pre_ref_s, tasks_ref_s = _reference_forward(x, None, params, TASKS)
    assert jnp.allclose(pre_s, pre_ref_s, atol=1e-4, rtol=1e-4)
    for t in TASKS:
        assert jnp.allclose(tasks_s[t], tasks_ref_s[t], atol=1e-4, rtol=1e-4)

    print("KERNEL_OK")
</pallas_src>

<mosaic_0001>
module attributes {stable_mosaic.version = 11 : i64} {
  func.func @_mtlora_kernel_per_task_inputs(%arg0: i32, %arg1: i32, %arg2: memref<512x4xf32, #tpu.memory_space<vmem>>, %arg3: memref<2x512x4xf32, #tpu.memory_space<vmem>>, %arg4: memref<4x128xf32, #tpu.memory_space<vmem>>, %arg5: memref<1x128xf32, #tpu.memory_space<vmem>>, %arg6: memref<2x4x128xf32, #tpu.memory_space<vmem>>, %arg7: memref<512x128xf32, #tpu.memory_space<vmem>>, %arg8: memref<2x512x128xf32, #tpu.memory_space<vmem>>) attributes {dimension_semantics = [#tpu.dimension_semantics<parallel>, #tpu.dimension_semantics<parallel>], iteration_bounds = array<i64: 1, 1>, scalar_prefetch = 0 : i64, scratch_operands = 0 : i64, tpu.core_type = #tpu.core_type<tc>, window_params = [{transform_indices = @transform_0, window_bounds = array<i64: 512, 4>}, {transform_indices = @transform_1, window_bounds = array<i64: 2, 512, 4>}, {transform_indices = @transform_2, window_bounds = array<i64: 4, 128>}, {transform_indices = @transform_3, window_bounds = array<i64: 1, 128>}, {transform_indices = @transform_4, window_bounds = array<i64: 2, 4, 128>}, {transform_indices = @transform_5, window_bounds = array<i64: 512, 128>}, {transform_indices = @transform_6, window_bounds = array<i64: 2, 512, 128>}]} {
    %c0 = arith.constant 0 : index
    %c0_0 = arith.constant 0 : index
    %0 = vector.load %arg5[%c0, %c0_0] : memref<1x128xf32, #tpu.memory_space<vmem>>, vector<1x128xf32>
    %c0_1 = arith.constant 0 : index
    %c0_2 = arith.constant 0 : index
    %1 = vector.load %arg2[%c0_1, %c0_2] : memref<512x4xf32, #tpu.memory_space<vmem>>, vector<512x4xf32>
    %c0_3 = arith.constant 0 : index
    %c0_4 = arith.constant 0 : index
    %2 = vector.load %arg4[%c0_3, %c0_4] : memref<4x128xf32, #tpu.memory_space<vmem>>, vector<4x128xf32>
    %cst = arith.constant dense<0.000000e+00> : vector<512x128xf32>
    %3 = tpu.matmul %1, %2, %cst {dimension_numbers = #tpu.dot_dimension_numbers<[1], [0], [0], [1], [0, 0, 1, 1], [], []>} : vector<512x4xf32>, vector<4x128xf32>, vector<512x128xf32> -> vector<512x128xf32>
    %4 = vector.broadcast %0 : vector<1x128xf32> to vector<512x128xf32>
    %5 = arith.addf %3, %4 : vector<512x128xf32>
    %c0_5 = arith.constant 0 : index
    %c0_6 = arith.constant 0 : index
    %6 = vector.load %arg7[%c0_5, %c0_6] : memref<512x128xf32, #tpu.memory_space<vmem>>, vector<512x128xf32>
    tpu.vector_store %arg7[%c0_5, %c0_6], %5 {strides = array<i32>} : memref<512x128xf32, #tpu.memory_space<vmem>>, vector<512x128xf32>,
    %7 = vector.broadcast %0 : vector<1x128xf32> to vector<512x128xf32>
    %8 = arith.addf %5, %7 : vector<512x128xf32>
    %c0_7 = arith.constant 0 : index
    %c0_8 = arith.constant 0 : index
    %c0_9 = arith.constant 0 : index
    %9 = vector.load %arg3[%c0_7, %c0_8, %c0_9] : memref<2x512x4xf32, #tpu.memory_space<vmem>>, vector<1x512x4xf32>
    %10 = vector.shape_cast %9 : vector<1x512x4xf32> to vector<512x4xf32>
    %c0_10 = arith.constant 0 : index
    %c0_11 = arith.constant 0 : index
    %c0_12 = arith.constant 0 : index
    %11 = vector.load %arg6[%c0_10, %c0_11, %c0_12] : memref<2x4x128xf32, #tpu.memory_space<vmem>>, vector<1x4x128xf32>
    %12 = vector.shape_cast %11 : vector<1x4x128xf32> to vector<4x128xf32>
    %cst_13 = arith.constant dense<0.000000e+00> : vector<512x128xf32>
    %13 = tpu.matmul %10, %12, %cst_13 {dimension_numbers = #tpu.dot_dimension_numbers<[1], [0], [0], [1], [0, 0, 1, 1], [], []>} : vector<512x4xf32>, vector<4x128xf32>, vector<512x128xf32> -> vector<512x128xf32>
    %14 = arith.addf %8, %13 : vector<512x128xf32>
    %c0_14 = arith.constant 0 : index
    %c0_15 = arith.constant 0 : index
    %c0_16 = arith.constant 0 : index
    %15 = vector.load %arg8[%c0_14, %c0_15, %c0_16] : memref<2x512x128xf32, #tpu.memory_space<vmem>>, vector<1x512x128xf32>
    %16 = vector.shape_cast %15 : vector<1x512x128xf32> to vector<512x128xf32>
    %17 = vector.shape_cast %14 : vector<512x128xf32> to vector<1x512x128xf32>
    tpu.vector_store %arg8[%c0_14, %c0_15, %c0_16], %17 {strides = array<i32>} : memref<2x512x128xf32, #tpu.memory_space<vmem>>, vector<1x512x128xf32>,
    %c1 = arith.constant 1 : index
    %c0_17 = arith.constant 0 : index
    %c0_18 = arith.constant 0 : index
    %18 = vector.load %arg3[%c1, %c0_17, %c0_18] : memref<2x512x4xf32, #tpu.memory_space<vmem>>, vector<1x512x4xf32>
    %19 = vector.shape_cast %18 : vector<1x512x4xf32> to vector<512x4xf32>
    %c1_19 = arith.constant 1 : index
    %c0_20 = arith.constant 0 : index
    %c0_21 = arith.constant 0 : index
    %20 = vector.load %arg6[%c1_19, %c0_20, %c0_21] : memref<2x4x128xf32, #tpu.memory_space<vmem>>, vector<1x4x128xf32>
    %21 = vector.shape_cast %20 : vector<1x4x128xf32> to vector<4x128xf32>
    %cst_22 = arith.constant dense<0.000000e+00> : vector<512x128xf32>
    %22 = tpu.matmul %19, %21, %cst_22 {dimension_numbers = #tpu.dot_dimension_numbers<[1], [0], [0], [1], [0, 0, 1, 1], [], []>} : vector<512x4xf32>, vector<4x128xf32>, vector<512x128xf32> -> vector<512x128xf32>
    %23 = arith.addf %8, %22 : vector<512x128xf32>
    %c1_23 = arith.constant 1 : index
    %c0_24 = arith.constant 0 : index
    %c0_25 = arith.constant 0 : index
    %24 = vector.load %arg8[%c1_23, %c0_24, %c0_25] : memref<2x512x128xf32, #tpu.memory_space<vmem>>, vector<1x512x128xf32>
    %25 = vector.shape_cast %24 : vector<1x512x128xf32> to vector<512x128xf32>
    %26 = vector.shape_cast %23 : vector<512x128xf32> to vector<1x512x128xf32>
    tpu.vector_store %arg8[%c1_23, %c0_24, %c0_25], %26 {strides = array<i32>} : memref<2x512x128xf32, #tpu.memory_space<vmem>>, vector<1x512x128xf32>,
    return
  }
  func.func @transform_0(%arg0: i32, %arg1: i32) -> (i32, i32) {
    %c0_i32 = arith.constant 0 : i32
    %c0_i32_0 = arith.constant 0 : i32
    return %arg1, %c0_i32 : i32, i32
  }
  func.func @transform_1(%arg0: i32, %arg1: i32) -> (i32, i32, i32) {
    %c0_i32 = arith.constant 0 : i32
    %c0_i32_0 = arith.constant 0 : i32
    %c0_i32_1 = arith.constant 0 : i32
    return %c0_i32, %arg1, %c0_i32_0 : i32, i32, i32
  }
  func.func @transform_2(%arg0: i32, %arg1: i32) -> (i32, i32) {
    %c0_i32 = arith.constant 0 : i32
    %c0_i32_0 = arith.constant 0 : i32
    return %c0_i32, %arg0 : i32, i32
  }
  func.func @transform_3(%arg0: i32, %arg1: i32) -> (i32, i32) {
    %c0_i32 = arith.constant 0 : i32
    %c0_i32_0 = arith.constant 0 : i32
    return %c0_i32, %arg0 : i32, i32
  }
  func.func @transform_4(%arg0: i32, %arg1: i32) -> (i32, i32, i32) {
    %c0_i32 = arith.constant 0 : i32
    %c0_i32_0 = arith.constant 0 : i32
    %c0_i32_1 = arith.constant 0 : i32
    return %c0_i32, %c0_i32_0, %arg0 : i32, i32, i32
  }
  func.func @transform_5(%arg0: i32, %arg1: i32) -> (i32, i32) {
    %c0_i32 = arith.constant 0 : i32
    return %arg1, %arg0 : i32, i32
  }
  func.func @transform_6(%arg0: i32, %arg1: i32) -> (i32, i32, i32) {
    %c0_i32 = arith.constant 0 : i32
    %c0_i32_0 = arith.constant 0 : i32
    return %c0_i32, %arg1, %arg0 : i32, i32, i32
  }
}

</mosaic_0001>

<bundles_post_ra>
// kernel: mtlora_conv_forward.1
= control target key start
LH: loop header
LB: loop body
LE: loop exit
PB: predicated region body
PF: predicated region fallthrough
CT: control target
= control target key end

     0   :  { %vm287_vm0 = vcmask 1043456   ;;  %vm94_vm1 = vcmask 31744   ;;  %s4962_s2 = inlined_call_operand.vmem [shape: f32[4,128], index: 2, kind: input, shape index: {}]   ;;  %s4963_s0 = inlined_call_operand.vmem [shape: f32[512,4], index: 0, kind: input, shape index: {}]   ;;  %s4964_s4 = inlined_call_operand.vmem [shape: f32[2,4,128], index: 4, kind: input, shape index: {}]   ;;  %s4965_s1 = inlined_call_operand.vmem [shape: f32[2,512,4], index: 1, kind: input, shape index: {}]   ;;  %s4966_s3 = inlined_call_operand.vmem [shape: f32[1,128], index: 3, kind: input, shape index: {}]   ;;  %s4967_s5 = inlined_call_operand.vmem [shape: f32[512,128], index: 5, kind: output, shape index: {0}]   ;;  %s4968_s6 = inlined_call_operand.vmem [shape: f32[2,512,128], index: 6, kind: output, shape index: {1}]  }
   0x1   :  { %v87_v0 = vld [vmem:[%s4962_s2] sm:$0xf]  ;;  %v24_v3 = vld [vmem:[%s4963_s0 + $0x8] sm:$0xff]  ;;  %v2556_v6 = vld [vmem:[%s4964_s4 + $0x4] sm:$0xf] }
   0x2   :  { %v23_v1 = vld [vmem:[%s4963_s0] sm:$0xff]  ;;  %2881 = vmatprep.subr.msk.mxu0 %vm287_vm0, %v87_v0  ;;  %3175 = vmatprep.subr.msk.mxu1 %vm287_vm0, %v87_v0  ;;  %v56_v4 = vld [vmem:[%s4963_s0 + $0x108] sm:$0xff]  ;;  %v25_v7 = vld [vmem:[%s4963_s0 + $0x10] sm:$0xff] }
   0x3   :  { %v55_v2 = vld [vmem:[%s4963_s0 + $0x100] sm:$0xff]  ;;  %2882 = vmatpush3.msk.msra.mxu0 %vm287_vm0, %v87_v0  ;;  %3176 = vmatpush3.msk.msra.mxu1 %vm287_vm0, %v87_v0  ;;  %v57_v8 = vld [vmem:[%s4963_s0 + $0x110] sm:$0xff]  ;;  %v26_v9 = vld [vmem:[%s4963_s0 + $0x18] sm:$0xff] }
   0x4   :  { %v868_v5 = vld [vmem:[%s4964_s4] sm:$0xf]  ;;  %2883 = vmatprep.mubr.msk.f32.mxu0 %vm94_vm1, %v23_v1  ;;  %2931 = vmatprep.mubr.msk.f32.mxu1 %vm94_vm1, %v55_v2  ;;  %v58_v10 = vld [vmem:[%s4963_s0 + $0x118] sm:$0xff]  ;;  %v28_v13 = vld [vmem:[%s4963_s0 + $0x28] sm:$0xff] }
   0x5   :  { %2884 = vmatmul.mubr.msk.f32.vlgmr.msra.gmra.mxu0 %vm94_vm1, %v24_v3  ;;  %2932 = vmatmul.mubr.msk.f32.vlgmr.msra.gmra.mxu1 %vm94_vm1, %v56_v4  ;;  %v27_v11 = vld [vmem:[%s4963_s0 + $0x20] sm:$0xff]  ;;  %v60_v14 = vld [vmem:[%s4963_s0 + $0x128] sm:$0xff]  ;;  %v29_v15 = vld [vmem:[%s4963_s0 + $0x30] sm:$0xff] }
   0x6   :  { %2979 = vmatprep.subr.msk.mxu1 %vm287_vm0, %v868_v5  ;;  %3077 = vmatprep.subr.msk.mxu0 %vm287_vm0, %v2556_v6  ;;  %v59_v12 = vld [vmem:[%s4963_s0 + $0x120] sm:$0xff]  ;;  %v61_v16 = vld [vmem:[%s4963_s0 + $0x130] sm:$0xff]  ;;  %v30_v17 = vld [vmem:[%s4963_s0 + $0x38] sm:$0xff] }
   0x7   :  { %2980 = vmatpush3.msk.msra.mxu1 %vm287_vm0, %v868_v5  ;;  %3078 = vmatpush3.msk.msra.mxu0 %vm287_vm0, %v2556_v6  ;;  %v62_v18 = vld [vmem:[%s4963_s0 + $0x138] sm:$0xff]  ;;  %v31_v19 = vld [vmem:[%s4963_s0 + $0x40] sm:$0xff]  ;;  %v32_v21 = vld [vmem:[%s4963_s0 + $0x48] sm:$0xff] }
   0x8   :  { %2886 = vmatprep.mubr.msk.f32.mxu0 %vm94_vm1, %v25_v7  ;;  %2934 = vmatprep.mubr.msk.f32.mxu1 %vm94_vm1, %v57_v8  ;;  %v63_v20 = vld [vmem:[%s4963_s0 + $0x140] sm:$0xff]  ;;  %v64_v22 = vld [vmem:[%s4963_s0 + $0x148] sm:$0xff]  ;;  %v33_v23 = vld [vmem:[%s4963_s0 + $0x50] sm:$0xff] }
   0x9   :  { %2887 = vmatmul.mubr.msk.f32.gmra.mxu0 %vm94_vm1, %v26_v9  ;;  %2935 = vmatmul.mubr.msk.f32.gmra.mxu1 %vm94_vm1, %v58_v10  ;;  %v65_v24 = vld [vmem:[%s4963_s0 + $0x150] sm:$0xff]  ;;  %v34_v25 = vld [vmem:[%s4963_s0 + $0x58] sm:$0xff]  ;;  %v35_v27 = vld [vmem:[%s4963_s0 + $0x60] sm:$0xff] }
   0xa   :  { %2889 = vmatprep.mubr.msk.f32.mxu0 %vm94_vm1, %v27_v11  ;;  %2937 = vmatprep.mubr.msk.f32.mxu1 %vm94_vm1, %v59_v12  ;;  %v66_v26 = vld [vmem:[%s4963_s0 + $0x158] sm:$0xff]  ;;  %v67_v28 = vld [vmem:[%s4963_s0 + $0x160] sm:$0xff]  ;;  %v36_v29 = vld [vmem:[%s4963_s0 + $0x68] sm:$0xff] }
   0xb   :  { %v68_v30 = vld [vmem:[%s4963_s0 + $0x168] sm:$0xff]  ;;  %v37_v31 = vld [vmem:[%s4963_s0 + $0x70] sm:$0xff]  ;;  %v38_v33 = vld [vmem:[%s4963_s0 + $0x78] sm:$0xff] }
   0xc   :  { %v69_v32 = vld [vmem:[%s4963_s0 + $0x170] sm:$0xff]  ;;  %v70_v34 = vld [vmem:[%s4963_s0 + $0x178] sm:$0xff]  ;;  %v39_v35 = vld [vmem:[%s4963_s0 + $0x80] sm:$0xff] }
   0xd   :  { %2890 = vmatmul.mubr.msk.f32.gmra.mxu0 %vm94_vm1, %v28_v13  ;;  %2938 = vmatmul.mubr.msk.f32.gmra.mxu1 %vm94_vm1, %v60_v14  ;;  %v71_v36 = vld [vmem:[%s4963_s0 + $0x180] sm:$0xff]  ;;  %v40_v37 = vld [vmem:[%s4963_s0 + $0x88] sm:$0xff]  ;;  %v41_v39 = vld [vmem:[%s4963_s0 + $0x90] sm:$0xff] }
   0xe   :  { %2892 = vmatprep.mubr.msk.f32.mxu0 %vm94_vm1, %v29_v15  ;;  %2940 = vmatprep.mubr.msk.f32.mxu1 %vm94_vm1, %v61_v16  ;;  %v72_v38 = vld [vmem:[%s4963_s0 + $0x188] sm:$0xff]  ;;  %v73_v40 = vld [vmem:[%s4963_s0 + $0x190] sm:$0xff]  ;;  %v42_v41 = vld [vmem:[%s4963_s0 + $0x98] sm:$0xff] }
   0xf   :  { %v74_v42 = vld [vmem:[%s4963_s0 + $0x198] sm:$0xff]  ;;  %v43_v43 = vld [vmem:[%s4963_s0 + $0xa0] sm:$0xff]  ;;  %v44_v45 = vld [vmem:[%s4963_s0 + $0xa8] sm:$0xff] }
  0x10   :  { %v75_v44 = vld [vmem:[%s4963_s0 + $0x1a0] sm:$0xff]  ;;  %v76_v46 = vld [vmem:[%s4963_s0 + $0x1a8] sm:$0xff]  ;;  %v45_v47 = vld [vmem:[%s4963_s0 + $0xb0] sm:$0xff] }
  0x11   :  { %2893 = vmatmul.mubr.msk.f32.gmra.mxu0 %vm94_vm1, %v30_v17  ;;  %2941 = vmatmul.mubr.msk.f32.gmra.mxu1 %vm94_vm1, %v62_v18  ;;  %v77_v48 = vld [vmem:[%s4963_s0 + $0x1b0] sm:$0xff]  ;;  %v46_v49 = vld [vmem:[%s4963_s0 + $0xb8] sm:$0xff]  ;;  %v47_v51 = vld [vmem:[%s4963_s0 + $0xc0] sm:$0xff] }
  0x12   :  { %2895 = vmatprep.mubr.msk.f32.mxu0 %vm94_vm1, %v31_v19  ;;  %2943 = vmatprep.mubr.msk.f32.mxu1 %vm94_vm1, %v63_v20  ;;  %v78_v50 = vld [vmem:[%s4963_s0 + $0x1b8] sm:$0xff]  ;;  %v79_v52 = vld [vmem:[%s4963_s0 + $0x1c0] sm:$0xff]  ;;  %v48_v53 = vld [vmem:[%s4963_s0 + $0xc8] sm:$0xff] }
  0x13   :  { %v80_v54 = vld [vmem:[%s4963_s0 + $0x1c8] sm:$0xff]  ;;  %v49_v55 = vld [vmem:[%s4963_s0 + $0xd0] sm:$0xff]  ;;  %v50_v57 = vld [vmem:[%s4963_s0 + $0xd8] sm:$0xff] }
  0x14   :  { %v81_v56 = vld [vmem:[%s4963_s0 + $0x1d0] sm:$0xff]  ;;  %v82_v58 = vld [vmem:[%s4963_s0 + $0x1d8] sm:$0xff]  ;;  %v51_v59 = vld [vmem:[%s4963_s0 + $0xe0] sm:$0xff] }
  0x15   :  { %2896 = vmatmul.mubr.msk.f32.gmra.mxu0 %vm94_vm1, %v32_v21  ;;  %2944 = vmatmul.mubr.msk.f32.gmra.mxu1 %vm94_vm1, %v64_v22  ;;  %v83_v60 = vld [vmem:[%s4963_s0 + $0x1e0] sm:$0xff]  ;;  %v52_v61 = vld [vmem:[%s4963_s0 + $0xe8] sm:$0xff]  ;;  %v53_v63 = vld [vmem:[%s4963_s0 + $0xf0] sm:$0xff] }
  0x16   :  { %2898 = vmatprep.mubr.msk.f32.mxu0 %vm94_vm1, %v33_v23  ;;  %2946 = vmatprep.mubr.msk.f32.mxu1 %vm94_vm1, %v65_v24  ;;  %v84_v62 = vld [vmem:[%s4963_s0 + $0x1e8] sm:$0xff]  ;;  %v85_v0 = vld [vmem:[%s4963_s0 + $0x1f0] sm:$0xff]  ;;  %v54_v1 = vld [vmem:[%s4963_s0 + $0xf8] sm:$0xff] }
  0x17   :  { %v86_v2 = vld [vmem:[%s4963_s0 + $0x1f8] sm:$0xff]  ;;  %v804_v3 = vld [vmem:[%s4965_s1] sm:$0xff]  ;;  %v805_v5 = vld [vmem:[%s4965_s1 + $0x8] sm:$0xff] }
  0x18   :  { %v2492_v4 = vld [vmem:[%s4965_s1 + $0x200] sm:$0xff]  ;;  %v2493_v6 = vld [vmem:[%s4965_s1 + $0x208] sm:$0xff]  ;;  %v806_v7 = vld [vmem:[%s4965_s1 + $0x10] sm:$0xff] }
  0x19   :  { %2899 = vmatmul.mubr.msk.f32.gmra.mxu0 %vm94_vm1, %v34_v25  ;;  %2947 = vmatmul.mubr.msk.f32.gmra.mxu1 %vm94_vm1, %v66_v26  ;;  %v2494_v8 = vld [vmem:[%s4965_s1 + $0x210] sm:$0xff]  ;;  %v807_v9 = vld [vmem:[%s4965_s1 + $0x18] sm:$0xff]  ;;  %v808_v11 = vld [vmem:[%s4965_s1 + $0x20] sm:$0xff] }
  0x1a   :  { %2901 = vmatprep.mubr.msk.f32.mxu0 %vm94_vm1, %v35_v27  ;;  %2949 = vmatprep.mubr.msk.f32.mxu1 %vm94_vm1, %v67_v28  ;;  %v2495_v10 = vld [vmem:[%s4965_s1 + $0x218] sm:$0xff]  ;;  %v2496_v12 = vld [vmem:[%s4965_s1 + $0x220] sm:$0xff]  ;;  %v809_v13 = vld [vmem:[%s4965_s1 + $0x28] sm:$0xff] }
  0x1b   :  { %v2497_v14 = vld [vmem:[%s4965_s1 + $0x228] sm:$0xff]  ;;  %v810_v15 = vld [vmem:[%s4965_s1 + $0x30] sm:$0xff]  ;;  %v811_v17 = vld [vmem:[%s4965_s1 + $0x38] sm:$0xff] }
  0x1c   :  { %v2498_v16 = vld [vmem:[%s4965_s1 + $0x230] sm:$0xff]  ;;  %v2499_v18 = vld [vmem:[%s4965_s1 + $0x238] sm:$0xff]  ;;  %v812_v19 = vld [vmem:[%s4965_s1 + $0x40] sm:$0xff] }
  0x1d   :  { %2902 = vmatmul.mubr.msk.f32.gmra.mxu0 %vm94_vm1, %v36_v29  ;;  %2950 = vmatmul.mubr.msk.f32.gmra.mxu1 %vm94_vm1, %v68_v30  ;;  %v2500_v20 = vld [vmem:[%s4965_s1 + $0x240] sm:$0xff]  ;;  %v813_v21 = vld [vmem:[%s4965_s1 + $0x48] sm:$0xff]  ;;  %v814_v23 = vld [vmem:[%s4965_s1 + $0x50] sm:$0xff] }
  0x1e   :  { %2904 = vmatprep.mubr.msk.f32.mxu0 %vm94_vm1, %v37_v31  ;;  %2952 = vmatprep.mubr.msk.f32.mxu1 %vm94_vm1, %v69_v32  ;;  %v2501_v22 = vld [vmem:[%s4965_s1 + $0x248] sm:$0xff]  ;;  %v2502_v24 = vld [vmem:[%s4965_s1 + $0x250] sm:$0xff]  ;;  %v815_v25 = vld [vmem:[%s4965_s1 + $0x58] sm:$0xff] }
  0x1f   :  { %v2503_v26 = vld [vmem:[%s4965_s1 + $0x258] sm:$0xff]  ;;  %v816_v27 = vld [vmem:[%s4965_s1 + $0x60] sm:$0xff]  ;;  %v817_v29 = vld [vmem:[%s4965_s1 + $0x68] sm:$0xff] }
  0x20   :  { %v2504_v28 = vld [vmem:[%s4965_s1 + $0x260] sm:$0xff]  ;;  %v2505_v30 = vld [vmem:[%s4965_s1 + $0x268] sm:$0xff]  ;;  %v818_v31 = vld [vmem:[%s4965_s1 + $0x70] sm:$0xff] }
  0x21   :  { %2905 = vmatmul.mubr.msk.f32.gmra.mxu0 %vm94_vm1, %v38_v33  ;;  %2953 = vmatmul.mubr.msk.f32.gmra.mxu1 %vm94_vm1, %v70_v34  ;;  %v2506_v32 = vld [vmem:[%s4965_s1 + $0x270] sm:$0xff]  ;;  %v819_v33 = vld [vmem:[%s4965_s1 + $0x78] sm:$0xff] }
  0x22   :  { %2907 = vmatprep.mubr.msk.f32.mxu0 %vm94_vm1, %v39_v35  ;;  %2955 = vmatprep.mubr.msk.f32.mxu1 %vm94_vm1, %v71_v36  ;;  %v2507_v34 = vld [vmem:[%s4965_s1 + $0x278] sm:$0xff]  ;;  %v820_v35 = vld [vmem:[%s4965_s1 + $0x80] sm:$0xff] }
  0x23   :  { %v2508_v36 = vld [vmem:[%s4965_s1 + $0x280] sm:$0xff] }
  0x25   :  { %2908 = vmatmul.mubr.msk.f32.gmra.mxu0 %vm94_vm1, %v40_v37  ;;  %2956 = vmatmul.mubr.msk.f32.gmra.mxu1 %vm94_vm1, %v72_v38  ;;  %v821_v37 = vld [vmem:[%s4965_s1 + $0x88] sm:$0xff] }
  0x26   :  { %2910 = vmatprep.mubr.msk.f32.mxu0 %vm94_vm1, %v41_v39  ;;  %2958 = vmatprep.mubr.msk.f32.mxu1 %vm94_vm1, %v73_v40  ;;  %v2509_v38 = vld [vmem:[%s4965_s1 + $0x288] sm:$0xff]  ;;  %v822_v39 = vld [vmem:[%s4965_s1 + $0x90] sm:$0xff] }
  0x27   :  { %v2510_v40 = vld [vmem:[%s4965_s1 + $0x290] sm:$0xff] }
  0x29   :  { %2911 = vmatmul.mubr.msk.f32.gmra.mxu0 %vm94_vm1, %v42_v41  ;;  %2959 = vmatmul.mubr.msk.f32.gmra.mxu1 %vm94_vm1, %v74_v42  ;;  %v823_v41 = vld [vmem:[%s4965_s1 + $0x98] sm:$0xff] }
  0x2a   :  { %2913 = vmatprep.mubr.msk.f32.mxu0 %vm94_vm1, %v43_v43  ;;  %2961 = vmatprep.mubr.msk.f32.mxu1 %vm94_vm1, %v75_v44  ;;  %v2511_v42 = vld [vmem:[%s4965_s1 + $0x298] sm:$0xff]  ;;  %v824_v43 = vld [vmem:[%s4965_s1 + $0xa0] sm:$0xff] }
  0x2b   :  { %v2512_v44 = vld [vmem:[%s4965_s1 + $0x2a0] sm:$0xff] }
  0x2d   :  { %2914 = vmatmul.mubr.msk.f32.gmra.mxu0 %vm94_vm1, %v44_v45  ;;  %2962 = vmatmul.mubr.msk.f32.gmra.mxu1 %vm94_vm1, %v76_v46  ;;  %v825_v45 = vld [vmem:[%s4965_s1 + $0xa8] sm:$0xff] }
  0x2e   :  { %2916 = vmatprep.mubr.msk.f32.mxu0 %vm94_vm1, %v45_v47  ;;  %2964 = vmatprep.mubr.msk.f32.mxu1 %vm94_vm1, %v77_v48  ;;  %v2513_v46 = vld [vmem:[%s4965_s1 + $0x2a8] sm:$0xff]  ;;  %v826_v47 = vld [vmem:[%s4965_s1 + $0xb0] sm:$0xff] }
  0x2f   :  { %v2514_v48 = vld [vmem:[%s4965_s1 + $0x2b0] sm:$0xff] }
  0x31   :  { %2917 = vmatmul.mubr.msk.f32.gmra.mxu0 %vm94_vm1, %v46_v49  ;;  %2965 = vmatmul.mubr.msk.f32.gmra.mxu1 %vm94_vm1, %v78_v50  ;;  %v827_v49 = vld [vmem:[%s4965_s1 + $0xb8] sm:$0xff] }
  0x32   :  { %2919 = vmatprep.mubr.msk.f32.mxu0 %vm94_vm1, %v47_v51  ;;  %2967 = vmatprep.mubr.msk.f32.mxu1 %vm94_vm1, %v79_v52  ;;  %v2515_v50 = vld [vmem:[%s4965_s1 + $0x2b8] sm:$0xff]  ;;  %v828_v51 = vld [vmem:[%s4965_s1 + $0xc0] sm:$0xff] }
  0x33   :  { %v2516_v52 = vld [vmem:[%s4965_s1 + $0x2c0] sm:$0xff] }
  0x35   :  { %2920 = vmatmul.mubr.msk.f32.gmra.mxu0 %vm94_vm1, %v48_v53  ;;  %2968 = vmatmul.mubr.msk.f32.gmra.mxu1 %vm94_vm1, %v80_v54  ;;  %v829_v53 = vld [vmem:[%s4965_s1 + $0xc8] sm:$0xff] }
  0x36   :  { %2922 = vmatprep.mubr.msk.f32.mxu0 %vm94_vm1, %v49_v55  ;;  %2970 = vmatprep.mubr.msk.f32.mxu1 %vm94_vm1, %v81_v56  ;;  %v2517_v54 = vld [vmem:[%s4965_s1 + $0x2c8] sm:$0xff]  ;;  %v830_v55 = vld [vmem:[%s4965_s1 + $0xd0] sm:$0xff] }
  0x37   :  { %v2518_v56 = vld [vmem:[%s4965_s1 + $0x2d0] sm:$0xff] }
  0x39   :  { %2923 = vmatmul.mubr.msk.f32.gmra.mxu0 %vm94_vm1, %v50_v57  ;;  %2971 = vmatmul.mubr.msk.f32.gmra.mxu1 %vm94_vm1, %v82_v58  ;;  %v831_v57 = vld [vmem:[%s4965_s1 + $0xd8] sm:$0xff] }
  0x3a   :  { %2925 = vmatprep.mubr.msk.f32.mxu0 %vm94_vm1, %v51_v59  ;;  %2973 = vmatprep.mubr.msk.f32.mxu1 %vm94_vm1, %v83_v60  ;;  %v2519_v58 = vld [vmem:[%s4965_s1 + $0x2d8] sm:$0xff]  ;;  %v832_v59 = vld [vmem:[%s4965_s1 + $0xe0] sm:$0xff] }
  0x3b   :  { %v2520_v60 = vld [vmem:[%s4965_s1 + $0x2e0] sm:$0xff] }
  0x3d   :  { %2926 = vmatmul.mubr.msk.f32.gmra.mxu0 %vm94_vm1, %v52_v61  ;;  %2974 = vmatmul.mubr.msk.f32.gmra.mxu1 %vm94_vm1, %v84_v62  ;;  %v833_v61 = vld [vmem:[%s4965_s1 + $0xe8] sm:$0xff] }
  0x3e   :  { %2928 = vmatprep.mubr.msk.f32.mxu0 %vm94_vm1, %v53_v63  ;;  %2976 = vmatprep.mubr.msk.f32.mxu1 %vm94_vm1, %v85_v0  ;;  %v2521_v62 = vld [vmem:[%s4965_s1 + $0x2e8] sm:$0xff]  ;;  %v834_v63 = vld [vmem:[%s4965_s1 + $0xf0] sm:$0xff] }
  0x3f   :  { %v2522_v0 = vld [vmem:[%s4965_s1 + $0x2f0] sm:$0xff] }
  0x41   :  { %2929 = vmatmul.mubr.msk.f32.gmra.mxu0 %vm94_vm1, %v54_v1  ;;  %2977 = vmatmul.mubr.msk.f32.gmra.mxu1 %vm94_vm1, %v86_v2  ;;  %v835_v1 = vld [vmem:[%s4965_s1 + $0xf8] sm:$0xff] }
  0x42   :  { %2981 = vmatprep.mubr.msk.f32.mxu1 %vm94_vm1, %v804_v3  ;;  %3079 = vmatprep.mubr.msk.f32.mxu0 %vm94_vm1, %v2492_v4  ;;  %v2523_v2 = vld [vmem:[%s4965_s1 + $0x2f8] sm:$0xff]  ;;  %v836_v3 = vld [vmem:[%s4965_s1 + $0x100] sm:$0xff] }
  0x43   :  { %v2524_v4 = vld [vmem:[%s4965_s1 + $0x300] sm:$0xff] }
  0x45   :  { %2982 = vmatmul.mubr.msk.f32.vlgmr.msra.gmra.mxu1 %vm94_vm1, %v805_v5  ;;  %3080 = vmatmul.mubr.msk.f32.vlgmr.msra.gmra.mxu0 %vm94_vm1, %v2493_v6  ;;  %v837_v5 = vld [vmem:[%s4965_s1 + $0x108] sm:$0xff] }
  0x46   :  { %2984 = vmatprep.mubr.msk.f32.mxu1 %vm94_vm1, %v806_v7  ;;  %3082 = vmatprep.mubr.msk.f32.mxu0 %vm94_vm1, %v2494_v8  ;;  %v2525_v6 = vld [vmem:[%s4965_s1 + $0x308] sm:$0xff]  ;;  %v838_v7 = vld [vmem:[%s4965_s1 + $0x110] sm:$0xff] }
  0x47   :  { %v2526_v8 = vld [vmem:[%s4965_s1 + $0x310] sm:$0xff] }
  0x49   :  { %2985 = vmatmul.mubr.msk.f32.gmra.mxu1 %vm94_vm1, %v807_v9  ;;  %3083 = vmatmul.mubr.msk.f32.gmra.mxu0 %vm94_vm1, %v2495_v10  ;;  %v839_v9 = vld [vmem:[%s4965_s1 + $0x118] sm:$0xff] }
  0x4a   :  { %2987 = vmatprep.mubr.msk.f32.mxu1 %vm94_vm1, %v808_v11  ;;  %3085 = vmatprep.mubr.msk.f32.mxu0 %vm94_vm1, %v2496_v12  ;;  %v2527_v10 = vld [vmem:[%s4965_s1 + $0x318] sm:$0xff]  ;;  %v840_v11 = vld [vmem:[%s4965_s1 + $0x120] sm:$0xff] }
  0x4b   :  { %v2528_v12 = vld [vmem:[%s4965_s1 + $0x320] sm:$0xff] }
  0x4d   :  { %2988 = vmatmul.mubr.msk.f32.gmra.mxu1 %vm94_vm1, %v809_v13  ;;  %3086 = vmatmul.mubr.msk.f32.gmra.mxu0 %vm94_vm1, %v2497_v14  ;;  %v841_v13 = vld [vmem:[%s4965_s1 + $0x128] sm:$0xff] }
  0x4e   :  { %2990 = vmatprep.mubr.msk.f32.mxu1 %vm94_vm1, %v810_v15  ;;  %3088 = vmatprep.mubr.msk.f32.mxu0 %vm94_vm1, %v2498_v16  ;;  %v2529_v14 = vld [vmem:[%s4965_s1 + $0x328] sm:$0xff]  ;;  %v842_v15 = vld [vmem:[%s4965_s1 + $0x130] sm:$0xff] }
  0x4f   :  { %v2530_v16 = vld [vmem:[%s4965_s1 + $0x330] sm:$0xff] }
  0x51   :  { %2991 = vmatmul.mubr.msk.f32.gmra.mxu1 %vm94_vm1, %v811_v17  ;;  %3089 = vmatmul.mubr.msk.f32.gmra.mxu0 %vm94_vm1, %v2499_v18  ;;  %v843_v17 = vld [vmem:[%s4965_s1 + $0x138] sm:$0xff] }
  0x52   :  { %2993 = vmatprep.mubr.msk.f32.mxu1 %vm94_vm1, %v812_v19  ;;  %3091 = vmatprep.mubr.msk.f32.mxu0 %vm94_vm1, %v2500_v20  ;;  %v2531_v18 = vld [vmem:[%s4965_s1 + $0x338] sm:$0xff]  ;;  %v844_v19 = vld [vmem:[%s4965_s1 + $0x140] sm:$0xff] }
  0x53   :  { %v2532_v20 = vld [vmem:[%s4965_s1 + $0x340] sm:$0xff] }
  0x55   :  { %2994 = vmatmul.mubr.msk.f32.gmra.mxu1 %vm94_vm1, %v813_v21  ;;  %3092 = vmatmul.mubr.msk.f32.gmra.mxu0 %vm94_vm1, %v2501_v22  ;;  %v845_v21 = vld [vmem:[%s4965_s1 + $0x148] sm:$0xff] }
  0x56   :  { %2996 = vmatprep.mubr.msk.f32.mxu1 %vm94_vm1, %v814_v23  ;;  %3094 = vmatprep.mubr.msk.f32.mxu0 %vm94_vm1, %v2502_v24  ;;  %v2533_v22 = vld [vmem:[%s4965_s1 + $0x348] sm:$0xff]  ;;  %v846_v23 = vld [vmem:[%s4965_s1 + $0x150] sm:$0xff] }
  0x57   :  { %v2534_v24 = vld [vmem:[%s4965_s1 + $0x350] sm:$0xff] }
  0x59   :  { %2997 = vmatmul.mubr.msk.f32.gmra.mxu1 %vm94_vm1, %v815_v25  ;;  %3095 = vmatmul.mubr.msk.f32.gmra.mxu0 %vm94_vm1, %v2503_v26  ;;  %v847_v25 = vld [vmem:[%s4965_s1 + $0x158] sm:$0xff] }
  0x5a   :  { %2999 = vmatprep.mubr.msk.f32.mxu1 %vm94_vm1, %v816_v27  ;;  %3097 = vmatprep.mubr.msk.f32.mxu0 %vm94_vm1, %v2504_v28  ;;  %v2535_v26 = vld [vmem:[%s4965_s1 + $0x358] sm:$0xff]  ;;  %v848_v27 = vld [vmem:[%s4965_s1 + $0x160] sm:$0xff] }
  0x5b   :  { %v2536_v28 = vld [vmem:[%s4965_s1 + $0x360] sm:$0xff] }
  0x5d   :  { %3000 = vmatmul.mubr.msk.f32.gmra.mxu1 %vm94_vm1, %v817_v29  ;;  %3098 = vmatmul.mubr.msk.f32.gmra.mxu0 %vm94_vm1, %v2505_v30  ;;  %v849_v29 = vld [vmem:[%s4965_s1 + $0x168] sm:$0xff] }
  0x5e   :  { %3002 = vmatprep.mubr.msk.f32.mxu1 %vm94_vm1, %v818_v31  ;;  %3100 = vmatprep.mubr.msk.f32.mxu0 %vm94_vm1, %v2506_v32  ;;  %v2537_v30 = vld [vmem:[%s4965_s1 + $0x368] sm:$0xff]  ;;  %v850_v31 = vld [vmem:[%s4965_s1 + $0x170] sm:$0xff] }
  0x5f   :  { %v2538_v32 = vld [vmem:[%s4965_s1 + $0x370] sm:$0xff] }
  0x61   :  { %3003 = vmatmul.mubr.msk.f32.gmra.mxu1 %vm94_vm1, %v819_v33  ;;  %3101 = vmatmul.mubr.msk.f32.gmra.mxu0 %vm94_vm1, %v2507_v34  ;;  %v851_v33 = vld [vmem:[%s4965_s1 + $0x178] sm:$0xff] }
  0x62   :  { %3005 = vmatprep.mubr.msk.f32.mxu1 %vm94_vm1, %v820_v35  ;;  %3103 = vmatprep.mubr.msk.f32.mxu0 %vm94_vm1, %v2508_v36  ;;  %v2539_v34 = vld [vmem:[%s4965_s1 + $0x378] sm:$0xff]  ;;  %v852_v35 = vld [vmem:[%s4965_s1 + $0x180] sm:$0xff] }
  0x63   :  { %v2540_v36 = vld [vmem:[%s4965_s1 + $0x380] sm:$0xff] }
  0x65   :  { %3006 = vmatmul.mubr.msk.f32.gmra.mxu1 %vm94_vm1, %v821_v37  ;;  %3104 = vmatmul.mubr.msk.f32.gmra.mxu0 %vm94_vm1, %v2509_v38  ;;  %v853_v37 = vld [vmem:[%s4965_s1 + $0x188] sm:$0xff] }
  0x66   :  { %3008 = vmatprep.mubr.msk.f32.mxu1 %vm94_vm1, %v822_v39  ;;  %3106 = vmatprep.mubr.msk.f32.mxu0 %vm94_vm1, %v2510_v40  ;;  %v2541_v38 = vld [vmem:[%s4965_s1 + $0x388] sm:$0xff]  ;;  %v854_v39 = vld [vmem:[%s4965_s1 + $0x190] sm:$0xff] }
  0x67   :  { %v2542_v40 = vld [vmem:[%s4965_s1 + $0x390] sm:$0xff] }
  0x69   :  { %3009 = vmatmul.mubr.msk.f32.gmra.mxu1 %vm94_vm1, %v823_v41  ;;  %3107 = vmatmul.mubr.msk.f32.gmra.mxu0 %vm94_vm1, %v2511_v42  ;;  %v855_v41 = vld [vmem:[%s4965_s1 + $0x198] sm:$0xff] }
  0x6a   :  { %3011 = vmatprep.mubr.msk.f32.mxu1 %vm94_vm1, %v824_v43  ;;  %3109 = vmatprep.mubr.msk.f32.mxu0 %vm94_vm1, %v2512_v44  ;;  %v2543_v42 = vld [vmem:[%s4965_s1 + $0x398] sm:$0xff]  ;;  %v856_v43 = vld [vmem:[%s4965_s1 + $0x1a0] sm:$0xff] }
  0x6b   :  { %v2544_v44 = vld [vmem:[%s4965_s1 + $0x3a0] sm:$0xff] }
  0x6d   :  { %3012 = vmatmul.mubr.msk.f32.gmra.mxu1 %vm94_vm1, %v825_v45  ;;  %3110 = vmatmul.mubr.msk.f32.gmra.mxu0 %vm94_vm1, %v2513_v46  ;;  %v857_v45 = vld [vmem:[%s4965_s1 + $0x1a8] sm:$0xff] }
  0x6e   :  { %3014 = vmatprep.mubr.msk.f32.mxu1 %vm94_vm1, %v826_v47  ;;  %3112 = vmatprep.mubr.msk.f32.mxu0 %vm94_vm1, %v2514_v48  ;;  %v2545_v46 = vld [vmem:[%s4965_s1 + $0x3a8] sm:$0xff]  ;;  %v858_v47 = vld [vmem:[%s4965_s1 + $0x1b0] sm:$0xff] }
  0x6f   :  { %v2546_v48 = vld [vmem:[%s4965_s1 + $0x3b0] sm:$0xff] }
  0x71   :  { %3015 = vmatmul.mubr.msk.f32.gmra.mxu1 %vm94_vm1, %v827_v49  ;;  %3113 = vmatmul.mubr.msk.f32.gmra.mxu0 %vm94_vm1, %v2515_v50  ;;  %v859_v49 = vld [vmem:[%s4965_s1 + $0x1b8] sm:$0xff] }
  0x72   :  { %3017 = vmatprep.mubr.msk.f32.mxu1 %vm94_vm1, %v828_v51  ;;  %3115 = vmatprep.mubr.msk.f32.mxu0 %vm94_vm1, %v2516_v52  ;;  %v2547_v50 = vld [vmem:[%s4965_s1 + $0x3b8] sm:$0xff]  ;;  %v860_v51 = vld [vmem:[%s4965_s1 + $0x1c0] sm:$0xff] }
  0x73   :  { %v2548_v52 = vld [vmem:[%s4965_s1 + $0x3c0] sm:$0xff] }
  0x75   :  { %3018 = vmatmul.mubr.msk.f32.gmra.mxu1 %vm94_vm1, %v829_v53  ;;  %3116 = vmatmul.mubr.msk.f32.gmra.mxu0 %vm94_vm1, %v2517_v54  ;;  %v861_v53 = vld [vmem:[%s4965_s1 + $0x1c8] sm:$0xff] }
  0x76   :  { %3020 = vmatprep.mubr.msk.f32.mxu1 %vm94_vm1, %v830_v55  ;;  %3118 = vmatprep.mubr.msk.f32.mxu0 %vm94_vm1, %v2518_v56  ;;  %v2549_v54 = vld [vmem:[%s4965_s1 + $0x3c8] sm:$0xff]  ;;  %v862_v55 = vld [vmem:[%s4965_s1 + $0x1d0] sm:$0xff] }
  0x77   :  { %v2550_v56 = vld [vmem:[%s4965_s1 + $0x3d0] sm:$0xff] }
  0x79   :  { %3021 = vmatmul.mubr.msk.f32.gmra.mxu1 %vm94_vm1, %v831_v57  ;;  %3119 = vmatmul.mubr.msk.f32.gmra.mxu0 %vm94_vm1, %v2519_v58  ;;  %v863_v57 = vld [vmem:[%s4965_s1 + $0x1d8] sm:$0xff] }
  0x7a   :  { %3023 = vmatprep.mubr.msk.f32.mxu1 %vm94_vm1, %v832_v59  ;;  %3121 = vmatprep.mubr.msk.f32.mxu0 %vm94_vm1, %v2520_v60  ;;  %v2551_v58 = vld [vmem:[%s4965_s1 + $0x3d8] sm:$0xff]  ;;  %v864_v59 = vld [vmem:[%s4965_s1 + $0x1e0] sm:$0xff] }
  0x7b   :  { %v2552_v60 = vld [vmem:[%s4965_s1 + $0x3e0] sm:$0xff] }
  0x7d   :  { %3024 = vmatmul.mubr.msk.f32.gmra.mxu1 %vm94_vm1, %v833_v61  ;;  %3122 = vmatmul.mubr.msk.f32.gmra.mxu0 %vm94_vm1, %v2521_v62  ;;  %v865_v61 = vld [vmem:[%s4965_s1 + $0x1e8] sm:$0xff] }
  0x7e   :  { %3026 = vmatprep.mubr.msk.f32.mxu1 %vm94_vm1, %v834_v63  ;;  %3124 = vmatprep.mubr.msk.f32.mxu0 %vm94_vm1, %v2522_v0  ;;  %v2553_v62 = vld [vmem:[%s4965_s1 + $0x3e8] sm:$0xff]  ;;  %v866_v63 = vld [vmem:[%s4965_s1 + $0x1f0] sm:$0xff] }
  0x7f   :  { %v2554_v0 = vld [vmem:[%s4965_s1 + $0x3f0] sm:$0xff] }
  0x81   :  { %3027 = vmatmul.mubr.msk.f32.gmra.mxu1 %vm94_vm1, %v835_v1  ;;  %3125 = vmatmul.mubr.msk.f32.gmra.mxu0 %vm94_vm1, %v2523_v2  ;;  %v867_v1 = vld [vmem:[%s4965_s1 + $0x1f8] sm:$0xff] }
  0x82   :  { %3029 = vmatprep.mubr.msk.f32.mxu1 %vm94_vm1, %v836_v3  ;;  %3127 = vmatprep.mubr.msk.f32.mxu0 %vm94_vm1, %v2524_v4  ;;  %v2555_v2 = vld [vmem:[%s4965_s1 + $0x3f8] sm:$0xff]  ;;  %v4000_v3 = vld [vmem:[%s4966_s3] ss:$0 sm:$0xff] }
  0x85   :  { %3030 = vmatmul.mubr.msk.f32.gmra.mxu1 %vm94_vm1, %v837_v5  ;;  %3128 = vmatmul.mubr.msk.f32.gmra.mxu0 %vm94_vm1, %v2525_v6 }
  0x86   :  { %3032 = vmatprep.mubr.msk.f32.mxu1 %vm94_vm1, %v838_v7  ;;  %3130 = vmatprep.mubr.msk.f32.mxu0 %vm94_vm1, %v2526_v8 }
  0x89   :  { %3033 = vmatmul.mubr.msk.f32.gmra.mxu1 %vm94_vm1, %v839_v9  ;;  %3131 = vmatmul.mubr.msk.f32.gmra.mxu0 %vm94_vm1, %v2527_v10 }
  0x8a   :  { %3035 = vmatprep.mubr.msk.f32.mxu1 %vm94_vm1, %v840_v11  ;;  %3133 = vmatprep.mubr.msk.f32.mxu0 %vm94_vm1, %v2528_v12 }
  0x8d   :  { %3036 = vmatmul.mubr.msk.f32.gmra.mxu1 %vm94_vm1, %v841_v13  ;;  %3134 = vmatmul.mubr.msk.f32.gmra.mxu0 %vm94_vm1, %v2529_v14 }
  0x8e   :  { %3038 = vmatprep.mubr.msk.f32.mxu1 %vm94_vm1, %v842_v15  ;;  %3136 = vmatprep.mubr.msk.f32.mxu0 %vm94_vm1, %v2530_v16 }
  0x91   :  { %3039 = vmatmul.mubr.msk.f32.gmra.mxu1 %vm94_vm1, %v843_v17  ;;  %3137 = vmatmul.mubr.msk.f32.gmra.mxu0 %vm94_vm1, %v2531_v18 }
  0x92   :  { %3041 = vmatprep.mubr.msk.f32.mxu1 %vm94_vm1, %v844_v19  ;;  %3139 = vmatprep.mubr.msk.f32.mxu0 %vm94_vm1, %v2532_v20 }
  0x95   :  { %3042 = vmatmul.mubr.msk.f32.gmra.mxu1 %vm94_vm1, %v845_v21  ;;  %3140 = vmatmul.mubr.msk.f32.gmra.mxu0 %vm94_vm1, %v2533_v22 }
  0x96   :  { %3044 = vmatprep.mubr.msk.f32.mxu1 %vm94_vm1, %v846_v23  ;;  %3142 = vmatprep.mubr.msk.f32.mxu0 %vm94_vm1, %v2534_v24 }
  0x99   :  { %3045 = vmatmul.mubr.msk.f32.gmra.mxu1 %vm94_vm1, %v847_v25  ;;  %3143 = vmatmul.mubr.msk.f32.gmra.mxu0 %vm94_vm1, %v2535_v26 }
  0x9a   :  { %3047 = vmatprep.mubr.msk.f32.mxu1 %vm94_vm1, %v848_v27  ;;  %3145 = vmatprep.mubr.msk.f32.mxu0 %vm94_vm1, %v2536_v28 }
  0x9d   :  { %3048 = vmatmul.mubr.msk.f32.gmra.mxu1 %vm94_vm1, %v849_v29  ;;  %3146 = vmatmul.mubr.msk.f32.gmra.mxu0 %vm94_vm1, %v2537_v30 }
  0x9e   :  { %3050 = vmatprep.mubr.msk.f32.mxu1 %vm94_vm1, %v850_v31  ;;  %3148 = vmatprep.mubr.msk.f32.mxu0 %vm94_vm1, %v2538_v32 }
  0xa1   :  { %3051 = vmatmul.mubr.msk.f32.gmra.mxu1 %vm94_vm1, %v851_v33  ;;  %3149 = vmatmul.mubr.msk.f32.gmra.mxu0 %vm94_vm1, %v2539_v34 }
  0xa2   :  { %3053 = vmatprep.mubr.msk.f32.mxu1 %vm94_vm1, %v852_v35  ;;  %3151 = vmatprep.mubr.msk.f32.mxu0 %vm94_vm1, %v2540_v36 }
  0xa5   :  { %3054 = vmatmul.mubr.msk.f32.gmra.mxu1 %vm94_vm1, %v853_v37  ;;  %3152 = vmatmul.mubr.msk.f32.gmra.mxu0 %vm94_vm1, %v2541_v38 }
  0xa6   :  { %3056 = vmatprep.mubr.msk.f32.mxu1 %vm94_vm1, %v854_v39  ;;  %3154 = vmatprep.mubr.msk.f32.mxu0 %vm94_vm1, %v2542_v40 }
  0xa9   :  { %3057 = vmatmul.mubr.msk.f32.gmra.mxu1 %vm94_vm1, %v855_v41  ;;  %3155 = vmatmul.mubr.msk.f32.gmra.mxu0 %vm94_vm1, %v2543_v42 }
  0xaa   :  { %3059 = vmatprep.mubr.msk.f32.mxu1 %vm94_vm1, %v856_v43  ;;  %3157 = vmatprep.mubr.msk.f32.mxu0 %vm94_vm1, %v2544_v44 }
  0xad   :  { %3060 = vmatmul.mubr.msk.f32.gmra.mxu1 %vm94_vm1, %v857_v45  ;;  %3158 = vmatmul.mubr.msk.f32.gmra.mxu0 %vm94_vm1, %v2545_v46 }
  0xae   :  { %3062 = vmatprep.mubr.msk.f32.mxu1 %vm94_vm1, %v858_v47  ;;  %3160 = vmatprep.mubr.msk.f32.mxu0 %vm94_vm1, %v2546_v48 }
  0xb1   :  { %3063 = vmatmul.mubr.msk.f32.gmra.mxu1 %vm94_vm1, %v859_v49  ;;  %3161 = vmatmul.mubr.msk.f32.gmra.mxu0 %vm94_vm1, %v2547_v50 }
  0xb2   :  { %3065 = vmatprep.mubr.msk.f32.mxu1 %vm94_vm1, %v860_v51  ;;  %3163 = vmatprep.mubr.msk.f32.mxu0 %vm94_vm1, %v2548_v52 }
  0xb5   :  { %3066 = vmatmul.mubr.msk.f32.gmra.mxu1 %vm94_vm1, %v861_v53  ;;  %3164 = vmatmul.mubr.msk.f32.gmra.mxu0 %vm94_vm1, %v2549_v54 }
  0xb6   :  { %3068 = vmatprep.mubr.msk.f32.mxu1 %vm94_vm1, %v862_v55  ;;  %3166 = vmatprep.mubr.msk.f32.mxu0 %vm94_vm1, %v2550_v56 }
  0xb9   :  { %3069 = vmatmul.mubr.msk.f32.gmra.mxu1 %vm94_vm1, %v863_v57  ;;  %3167 = vmatmul.mubr.msk.f32.gmra.mxu0 %vm94_vm1, %v2551_v58 }
  0xba   :  { %3071 = vmatprep.mubr.msk.f32.mxu1 %vm94_vm1, %v864_v59  ;;  %3169 = vmatprep.mubr.msk.f32.mxu0 %vm94_vm1, %v2552_v60 }
  0xbd   :  { %3072 = vmatmul.mubr.msk.f32.gmra.mxu1 %vm94_vm1, %v865_v61  ;;  %3170 = vmatmul.mubr.msk.f32.gmra.mxu0 %vm94_vm1, %v2553_v62 }
  0xbe   :  { %3074 = vmatprep.mubr.msk.f32.mxu1 %vm94_vm1, %v866_v63  ;;  %3172 = vmatprep.mubr.msk.f32.mxu0 %vm94_vm1, %v2554_v0 }
  0xc1   :  { %3075 = vmatmul.mubr.msk.f32.gmra.mxu1 %vm94_vm1, %v867_v1  ;;  %3173 = vmatmul.mubr.msk.f32.gmra.mxu0 %vm94_vm1, %v2555_v2 }
  0xc5   :  { %v2885_v4 = vpop.f32.mrf.mxu0  ;;  %v2933_v5 = vpop.f32.mrf.mxu1 }
  0xc6   :  { %v4003_v6 = vadd.f32 %v2885_v4, %v4000_v3  ;;  %v523_v7 = vadd.f32 %v2933_v5, %v4000_v3 }
  0xc7   :  { %v357_v8 = vpop.f32.mrf.mxu0  ;;  %v517_v9 = vpop.f32.mrf.mxu1 }
  0xc8   :  { %677 = vst [vmem:[%s4967_s5 + $0x8] sm:$0xff] %v4003_v6  ;;  %709 = vst [vmem:[%s4967_s5 + $0x108] sm:$0xff] %v523_v7  ;;  %v4014_v10 = vadd.f32 %v4000_v3, %v357_v8  ;;  %v518_v11 = vadd.f32 %v4000_v3, %v517_v9  ;;  %v4018_v12 = vadd.f32 %v4000_v3, %v523_v7 }
  0xc9   :  { %v2888_v13 = vpop.f32.mrf.mxu0  ;;  %v2936_v14 = vpop.f32.mrf.mxu1 }
  0xca   :  { %676 = vst [vmem:[%s4967_s5] sm:$0xff] %v4014_v10  ;;  %708 = vst [vmem:[%s4967_s5 + $0x100] sm:$0xff] %v518_v11  ;;  %v4028_v15 = vadd.f32 %v2888_v13, %v4000_v3  ;;  %v533_v16 = vadd.f32 %v2936_v14, %v4000_v3  ;;  %v4032_v17 = vadd.f32 %v4000_v3, %v518_v11 }
  0xcb   :  { %v367_v18 = vpop.f32.mrf.mxu0  ;;  %v527_v19 = vpop.f32.mrf.mxu1 }
  0xcc   :  { %679 = vst [vmem:[%s4967_s5 + $0x18] sm:$0xff] %v4028_v15  ;;  %711 = vst [vmem:[%s4967_s5 + $0x118] sm:$0xff] %v533_v16  ;;  %v4042_v20 = vadd.f32 %v4000_v3, %v367_v18  ;;  %v528_v21 = vadd.f32 %v4000_v3, %v527_v19  ;;  %v4046_v22 = vadd.f32 %v4000_v3, %v533_v16 }
  0xcd   :  { %v2891_v23 = vpop.f32.mrf.mxu0  ;;  %v2939_v24 = vpop.f32.mrf.mxu1 }
  0xce   :  { %678 = vst [vmem:[%s4967_s5 + $0x10] sm:$0xff] %v4042_v20  ;;  %710 = vst [vmem:[%s4967_s5 + $0x110] sm:$0xff] %v528_v21  ;;  %v4056_v25 = vadd.f32 %v2891_v23, %v4000_v3  ;;  %v543_v26 = vadd.f32 %v2939_v24, %v4000_v3  ;;  %v4060_v27 = vadd.f32 %v4000_v3, %v528_v21 }
  0xcf   :  { %v377_v28 = vpop.f32.mrf.mxu0  ;;  %v537_v29 = vpop.f32.mrf.mxu1 }
  0xd0   :  { %681 = vst [vmem:[%s4967_s5 + $0x28] sm:$0xff] %v4056_v25  ;;  %713 = vst [vmem:[%s4967_s5 + $0x128] sm:$0xff] %v543_v26  ;;  %v4070_v30 = vadd.f32 %v4000_v3, %v377_v28  ;;  %v538_v31 = vadd.f32 %v4000_v3, %v537_v29  ;;  %v4074_v32 = vadd.f32 %v4000_v3, %v543_v26 }
  0xd1   :  { %v2894_v33 = vpop.f32.mrf.mxu0  ;;  %v2942_v34 = vpop.f32.mrf.mxu1 }
  0xd2   :  { %680 = vst [vmem:[%s4967_s5 + $0x20] sm:$0xff] %v4070_v30  ;;  %712 = vst [vmem:[%s4967_s5 + $0x120] sm:$0xff] %v538_v31  ;;  %v4084_v35 = vadd.f32 %v2894_v33, %v4000_v3  ;;  %v553_v36 = vadd.f32 %v2942_v34, %v4000_v3  ;;  %v4088_v37 = vadd.f32 %v4000_v3, %v538_v31 }
  0xd3   :  { %v387_v38 = vpop.f32.mrf.mxu0  ;;  %v547_v39 = vpop.f32.mrf.mxu1 }
  0xd4   :  { %683 = vst [vmem:[%s4967_s5 + $0x38] sm:$0xff] %v4084_v35  ;;  %715 = vst [vmem:[%s4967_s5 + $0x138] sm:$0xff] %v553_v36  ;;  %v4098_v40 = vadd.f32 %v4000_v3, %v387_v38  ;;  %v548_v41 = vadd.f32 %v4000_v3, %v547_v39  ;;  %v4102_v42 = vadd.f32 %v4000_v3, %v553_v36 }
  0xd5   :  { %v2897_v43 = vpop.f32.mrf.mxu0  ;;  %v2945_v44 = vpop.f32.mrf.mxu1 }
  0xd6   :  { %682 = vst [vmem:[%s4967_s5 + $0x30] sm:$0xff] %v4098_v40  ;;  %714 = vst [vmem:[%s4967_s5 + $0x130] sm:$0xff] %v548_v41  ;;  %v4112_v45 = vadd.f32 %v2897_v43, %v4000_v3  ;;  %v563_v46 = vadd.f32 %v2945_v44, %v4000_v3  ;;  %v4116_v47 = vadd.f32 %v4000_v3, %v548_v41 }
  0xd7   :  { %v397_v48 = vpop.f32.mrf.mxu0  ;;  %v557_v49 = vpop.f32.mrf.mxu1 }
  0xd8   :  { %685 = vst [vmem:[%s4967_s5 + $0x48] sm:$0xff] %v4112_v45  ;;  %717 = vst [vmem:[%s4967_s5 + $0x148] sm:$0xff] %v563_v46  ;;  %v4126_v50 = vadd.f32 %v4000_v3, %v397_v48  ;;  %v558_v51 = vadd.f32 %v4000_v3, %v557_v49  ;;  %v4130_v52 = vadd.f32 %v4000_v3, %v563_v46 }
  0xd9   :  { %v2900_v53 = vpop.f32.mrf.mxu0  ;;  %v2948_v54 = vpop.f32.mrf.mxu1 }
  0xda   :  { %684 = vst [vmem:[%s4967_s5 + $0x40] sm:$0xff] %v4126_v50  ;;  %716 = vst [vmem:[%s4967_s5 + $0x140] sm:$0xff] %v558_v51  ;;  %v4140_v55 = vadd.f32 %v2900_v53, %v4000_v3  ;;  %v573_v56 = vadd.f32 %v2948_v54, %v4000_v3  ;;  %v4144_v57 = vadd.f32 %v4000_v3, %v558_v51 }
  0xdb   :  { %v407_v58 = vpop.f32.mrf.mxu0  ;;  %v567_v59 = vpop.f32.mrf.mxu1 }
  0xdc   :  { %687 = vst [vmem:[%s4967_s5 + $0x58] sm:$0xff] %v4140_v55  ;;  %719 = vst [vmem:[%s4967_s5 + $0x158] sm:$0xff] %v573_v56  ;;  %v4154_v60 = vadd.f32 %v4000_v3, %v407_v58  ;;  %v568_v61 = vadd.f32 %v4000_v3, %v567_v59  ;;  %v4158_v62 = vadd.f32 %v4000_v3, %v573_v56 }
  0xdd   :  { %v2903_v63 = vpop.f32.mrf.mxu0  ;;  %v2951_v0 = vpop.f32.mrf.mxu1 }
  0xde   :  { %686 = vst [vmem:[%s4967_s5 + $0x50] sm:$0xff] %v4154_v60  ;;  %718 = vst [vmem:[%s4967_s5 + $0x150] sm:$0xff] %v568_v61  ;;  %v4168_v1 = vadd.f32 %v2903_v63, %v4000_v3  ;;  %v583_v2 = vadd.f32 %v2951_v0, %v4000_v3  ;;  %v4172_v4 = vadd.f32 %v4000_v3, %v568_v61 }
  0xdf   :  { %v417_v5 = vpop.f32.mrf.mxu0  ;;  %v577_v7 = vpop.f32.mrf.mxu1 }
  0xe0   :  { %689 = vst [vmem:[%s4967_s5 + $0x68] sm:$0xff] %v4168_v1  ;;  %721 = vst [vmem:[%s4967_s5 + $0x168] sm:$0xff] %v583_v2  ;;  %v4182_v8 = vadd.f32 %v4000_v3, %v417_v5  ;;  %v578_v9 = vadd.f32 %v4000_v3, %v577_v7  ;;  %v4186_v11 = vadd.f32 %v4000_v3, %v583_v2 }
  0xe1   :  { %v2906_v13 = vpop.f32.mrf.mxu0  ;;  %v2954_v14 = vpop.f32.mrf.mxu1 }
  0xe2   :  { %688 = vst [vmem:[%s4967_s5 + $0x60] sm:$0xff] %v4182_v8  ;;  %720 = vst [vmem:[%s4967_s5 + $0x160] sm:$0xff] %v578_v9  ;;  %v4196_v16 = vadd.f32 %v2906_v13, %v4000_v3  ;;  %v593_v18 = vadd.f32 %v2954_v14, %v4000_v3  ;;  %v4200_v19 = vadd.f32 %v4000_v3, %v578_v9 }
  0xe3   :  { %v427_v21 = vpop.f32.mrf.mxu0  ;;  %v587_v23 = vpop.f32.mrf.mxu1 }
  0xe4   :  { %691 = vst [vmem:[%s4967_s5 + $0x78] sm:$0xff] %v4196_v16  ;;  %723 = vst [vmem:[%s4967_s5 + $0x178] sm:$0xff] %v593_v18  ;;  %v4210_v24 = vadd.f32 %v4000_v3, %v427_v21  ;;  %v588_v26 = vadd.f32 %v4000_v3, %v587_v23  ;;  %v4214_v28 = vadd.f32 %v4000_v3, %v593_v18 }
  0xe5   :  { %v2909_v29 = vpop.f32.mrf.mxu0  ;;  %v2957_v31 = vpop.f32.mrf.mxu1 }
  0xe6   :  { %690 = vst [vmem:[%s4967_s5 + $0x70] sm:$0xff] %v4210_v24  ;;  %722 = vst [vmem:[%s4967_s5 + $0x170] sm:$0xff] %v588_v26  ;;  %v4224_v33 = vadd.f32 %v2909_v29, %v4000_v3  ;;  %v603_v34 = vadd.f32 %v2957_v31, %v4000_v3  ;;  %v4228_v36 = vadd.f32 %v4000_v3, %v588_v26 }
  0xe7   :  { %v437_v38 = vpop.f32.mrf.mxu0  ;;  %v597_v39 = vpop.f32.mrf.mxu1 }
  0xe8   :  { %693 = vst [vmem:[%s4967_s5 + $0x88] sm:$0xff] %v4224_v33  ;;  %725 = vst [vmem:[%s4967_s5 + $0x188] sm:$0xff] %v603_v34  ;;  %v4238_v41 = vadd.f32 %v4000_v3, %v437_v38  ;;  %v598_v43 = vadd.f32 %v4000_v3, %v597_v39  ;;  %v4242_v44 = vadd.f32 %v4000_v3, %v603_v34 }
  0xe9   :  { %v2912_v46 = vpop.f32.mrf.mxu0  ;;  %v2960_v48 = vpop.f32.mrf.mxu1 }
  0xea   :  { %692 = vst [vmem:[%s4967_s5 + $0x80] sm:$0xff] %v4238_v41  ;;  %724 = vst [vmem:[%s4967_s5 + $0x180] sm:$0xff] %v598_v43  ;;  %v4252_v49 = vadd.f32 %v2912_v46, %v4000_v3  ;;  %v613_v51 = vadd.f32 %v2960_v48, %v4000_v3  ;;  %v4256_v53 = vadd.f32 %v4000_v3, %v598_v43 }
  0xeb   :  { %v447_v54 = vpop.f32.mrf.mxu0  ;;  %v607_v56 = vpop.f32.mrf.mxu1 }
  0xec   :  { %695 = vst [vmem:[%s4967_s5 + $0x98] sm:$0xff] %v4252_v49  ;;  %727 = vst [vmem:[%s4967_s5 + $0x198] sm:$0xff] %v613_v51  ;;  %v4266_v58 = vadd.f32 %v4000_v3, %v447_v54  ;;  %v608_v59 = vadd.f32 %v4000_v3, %v607_v56  ;;  %v4270_v61 = vadd.f32 %v4000_v3, %v613_v51 }
  0xed   :  { %v2915_v63 = vpop.f32.mrf.mxu0  ;;  %v2963_v0 = vpop.f32.mrf.mxu1 }
  0xee   :  { %694 = vst [vmem:[%s4967_s5 + $0x90] sm:$0xff] %v4266_v58  ;;  %726 = vst [vmem:[%s4967_s5 + $0x190] sm:$0xff] %v608_v59  ;;  %v4280_v2 = vadd.f32 %v2915_v63, %v4000_v3  ;;  %v623_v5 = vadd.f32 %v2963_v0, %v4000_v3  ;;  %v4284_v7 = vadd.f32 %v4000_v3, %v608_v59 }
  0xef   :  { %v457_v9 = vpop.f32.mrf.mxu0  ;;  %v617_v13 = vpop.f32.mrf.mxu1 }
  0xf0   :  { %697 = vst [vmem:[%s4967_s5 + $0xa8] sm:$0xff] %v4280_v2  ;;  %729 = vst [vmem:[%s4967_s5 + $0x1a8] sm:$0xff] %v623_v5  ;;  %v4294_v14 = vadd.f32 %v4000_v3, %v457_v9  ;;  %v618_v18 = vadd.f32 %v4000_v3, %v617_v13  ;;  %v4298_v21 = vadd.f32 %v4000_v3, %v623_v5 }
  0xf1   :  { %v2918_v23 = vpop.f32.mrf.mxu0  ;;  %v2966_v26 = vpop.f32.mrf.mxu1 }
  0xf2   :  { %4980 = vst [vmem:[#allocation2_spill] sm:$0xff] %v4298_v21  ;;  %696 = vst [vmem:[%s4967_s5 + $0xa0] sm:$0xff] %v4294_v14  ;;  %v4308_v29 = vadd.f32 %v2918_v23, %v4000_v3  ;;  %v633_v31 = vadd.f32 %v2966_v26, %v4000_v3  ;;  %v4312_v34 = vadd.f32 %v4000_v3, %v618_v18 }
  0xf3   :  { %728 = vst [vmem:[%s4967_s5 + $0x1a0] sm:$0xff] %v618_v18  ;;  %v467_v38 = vpop.f32.mrf.mxu0  ;;  %v627_v39 = vpop.f32.mrf.mxu1 }
  0xf4   :  { %4981 = vst [vmem:[#allocation3_spill] sm:$0xff] %v4312_v34  ;;  %699 = vst [vmem:[%s4967_s5 + $0xb8] sm:$0xff] %v4308_v29  ;;  %v4322_v43 = vadd.f32 %v4000_v3, %v467_v38  ;;  %v628_v46 = vadd.f32 %v4000_v3, %v627_v39  ;;  %v4326_v48 = vadd.f32 %v4000_v3, %v633_v31 }
  0xf5   :  { %731 = vst [vmem:[%s4967_s5 + $0x1b8] sm:$0xff] %v633_v31  ;;  %v2921_v51 = vpop.f32.mrf.mxu0  ;;  %v2969_v54 = vpop.f32.mrf.mxu1 }
  0xf6   :  { %4982 = vst [vmem:[#allocation4_spill] sm:$0xff] %v4326_v48  ;;  %698 = vst [vmem:[%s4967_s5 + $0xb0] sm:$0xff] %v4322_v43  ;;  %v4336_v56 = vadd.f32 %v2921_v51, %v4000_v3  ;;  %v643_v59 = vadd.f32 %v2969_v54, %v4000_v3  ;;  %v4340_v63 = vadd.f32 %v4000_v3, %v628_v46 }
  0xf7   :  { %730 = vst [vmem:[%s4967_s5 + $0x1b0] sm:$0xff] %v628_v46  ;;  %v477_v0 = vpop.f32.mrf.mxu0  ;;  %v637_v5 = vpop.f32.mrf.mxu1 }
  0xf8   :  { %4983 = vst [vmem:[#allocation5_spill] sm:$0xff] %v4340_v63  ;;  %701 = vst [vmem:[%s4967_s5 + $0xc8] sm:$0xff] %v4336_v56  ;;  %v4350_v9 = vadd.f32 %v4000_v3, %v477_v0  ;;  %v638_v13 = vadd.f32 %v4000_v3, %v637_v5  ;;  %v4354_v18 = vadd.f32 %v4000_v3, %v643_v59 }
  0xf9   :  { %733 = vst [vmem:[%s4967_s5 + $0x1c8] sm:$0xff] %v643_v59  ;;  %v2924_v23 = vpop.f32.mrf.mxu0  ;;  %v2972_v26 = vpop.f32.mrf.mxu1 }
  0xfa   :  { %4984 = vst [vmem:[#allocation6_spill] sm:$0xff] %v4354_v18  ;;  %700 = vst [vmem:[%s4967_s5 + $0xc0] sm:$0xff] %v4350_v9  ;;  %v4364_v31 = vadd.f32 %v2924_v23, %v4000_v3  ;;  %v653_v38 = vadd.f32 %v2972_v26, %v4000_v3  ;;  %v4368_v39 = vadd.f32 %v4000_v3, %v638_v13 }
  0xfb   :  { %732 = vst [vmem:[%s4967_s5 + $0x1c0] sm:$0xff] %v638_v13  ;;  %v487_v46 = vpop.f32.mrf.mxu0  ;;  %v647_v51 = vpop.f32.mrf.mxu1 }
  0xfc   :  { %4985 = vst [vmem:[#allocation7_spill] sm:$0xff] %v4368_v39  ;;  %703 = vst [vmem:[%s4967_s5 + $0xd8] sm:$0xff] %v4364_v31  ;;  %v4378_v54 = vadd.f32 %v4000_v3, %v487_v46  ;;  %v648_v59 = vadd.f32 %v4000_v3, %v647_v51  ;;  %v4382_v0 = vadd.f32 %v4000_v3, %v653_v38 }
  0xfd   :  { %735 = vst [vmem:[%s4967_s5 + $0x1d8] sm:$0xff] %v653_v38  ;;  %v2927_v5 = vpop.f32.mrf.mxu0  ;;  %v2975_v13 = vpop.f32.mrf.mxu1 }
  0xfe   :  { %4986 = vst [vmem:[#allocation8_spill] sm:$0xff] %v4382_v0  ;;  %702 = vst [vmem:[%s4967_s5 + $0xd0] sm:$0xff] %v4378_v54  ;;  %v4392_v23 = vadd.f32 %v2927_v5, %v4000_v3  ;;  %v663_v26 = vadd.f32 %v2975_v13, %v4000_v3  ;;  %v4396_v46 = vadd.f32 %v4000_v3, %v648_v59 }
  0xff   :  { %734 = vst [vmem:[%s4967_s5 + $0x1d0] sm:$0xff] %v648_v59  ;;  %v497_v38 = vpop.f32.mrf.mxu0  ;;  %v657_v51 = vpop.f32.mrf.mxu1 }
 0x100   :  { %4987 = vst [vmem:[#allocation9_spill] sm:$0xff] %v4396_v46  ;;  %705 = vst [vmem:[%s4967_s5 + $0xe8] sm:$0xff] %v4392_v23  ;;  %v4406_v0 = vadd.f32 %v4000_v3, %v497_v38  ;;  %v658_v5 = vadd.f32 %v4000_v3, %v657_v51  ;;  %v4410_v13 = vadd.f32 %v4000_v3, %v663_v26 }
 0x101   :  { %737 = vst [vmem:[%s4967_s5 + $0x1e8] sm:$0xff] %v663_v26  ;;  %v2930_v59 = vpop.f32.mrf.mxu0  ;;  %v2978_v46 = vpop.f32.mrf.mxu1 }
 0x102   :  { %4988 = vst [vmem:[#allocation10_spill] sm:$0xff] %v4410_v13  ;;  %704 = vst [vmem:[%s4967_s5 + $0xe0] sm:$0xff] %v4406_v0  ;;  %v4420_v39 = vadd.f32 %v2930_v59, %v4000_v3  ;;  %v673_v38 = vadd.f32 %v2978_v46, %v4000_v3  ;;  %v4424_v51 = vadd.f32 %v4000_v3, %v658_v5 }
 0x103   :  { %736 = vst [vmem:[%s4967_s5 + $0x1e0] sm:$0xff] %v658_v5  ;;  %v507_v26 = vpop.f32.mrf.mxu0  ;;  %v667_v13 = vpop.f32.mrf.mxu1  ;;  %v741_v46 = vadd.f32 %v4000_v3, %v4003_v6 }
 0x104   :  { %4989 = vst [vmem:[#allocation11_spill] sm:$0xff] %v4424_v51  ;;  %707 = vst [vmem:[%s4967_s5 + $0xf8] sm:$0xff] %v4420_v39  ;;  %v4434_v18 = vadd.f32 %v4000_v3, %v507_v26  ;;  %v668_v59 = vadd.f32 %v4000_v3, %v667_v13  ;;  %v4440_v5 = vadd.f32 %v4000_v3, %v673_v38 }
 0x105   :  { %739 = vst [vmem:[%s4967_s5 + $0x1f8] sm:$0xff] %v673_v38  ;;  %v2983_v51 = vpop.f32.mrf.mxu1  ;;  %v3081_v63 = vpop.f32.mrf.mxu0  ;;  %v740_v13 = vadd.f32 %v4000_v3, %v4014_v10 }
 0x106   :  { %4990 = vst [vmem:[#allocation12_spill] sm:$0xff] %v4440_v5  ;;  %706 = vst [vmem:[%s4967_s5 + $0xf0] sm:$0xff] %v4434_v18  ;;  %v1450_v26 = vadd.f32 %v2983_v51, %v741_v46  ;;  %v2225_v48 = vadd.f32 %v3081_v63, %v741_v46  ;;  %v4452_v6 = vadd.f32 %v4000_v3, %v668_v59 }
 0x107   :  { %738 = vst [vmem:[%s4967_s5 + $0x1f0] sm:$0xff] %v668_v59  ;;  %v1130_v38 = vpop.f32.mrf.mxu1  ;;  %v1905_v5 = vpop.f32.mrf.mxu0  ;;  %v743_v63 = vadd.f32 %v4000_v3, %v4028_v15 }
 0x108   :  { %1514 = vst [vmem:[%s4968_s6 + $0x8] sm:$0xff] %v1450_v26  ;;  %2623 = vst [vmem:[%s4968_s6 + $0x208] sm:$0xff] %v2225_v48  ;;  %v1449_v34 = vadd.f32 %v1130_v38, %v740_v13  ;;  %v2224_v21 = vadd.f32 %v1905_v5, %v740_v13  ;;  %v742_v48 = vadd.f32 %v4000_v3, %v4042_v20 }
 0x109   :  { %v2986_v51 = vpop.f32.mrf.mxu1  ;;  %v3084_v10 = vpop.f32.mrf.mxu0 }
 0x10a   :  { %1513 = vst [vmem:[%s4968_s6] sm:$0xff] %v1449_v34  ;;  %2622 = vst [vmem:[%s4968_s6 + $0x200] sm:$0xff] %v2224_v21  ;;  %v1452_v59 = vadd.f32 %v2986_v51, %v743_v63  ;;  %v2227_v46 = vadd.f32 %v3084_v10, %v743_v63  ;;  %v745_v21 = vadd.f32 %v4000_v3, %v4056_v25 }
 0x10b   :  { %v1140_v26 = vpop.f32.mrf.mxu1  ;;  %v1915_v5 = vpop.f32.mrf.mxu0  ;;  %v744_v51 = vadd.f32 %v4000_v3, %v4070_v30 }
 0x10c   :  { %1516 = vst [vmem:[%s4968_s6 + $0x18] sm:$0xff] %v1452_v59  ;;  %2625 = vst [vmem:[%s4968_s6 + $0x218] sm:$0xff] %v2227_v46  ;;  %v1451_v15 = vadd.f32 %v1140_v26, %v742_v48  ;;  %v2226_v34 = vadd.f32 %v1915_v5, %v742_v48  ;;  %v747_v48 = vadd.f32 %v4000_v3, %v4084_v35 }
 0x10d   :  { %v2989_v13 = vpop.f32.mrf.mxu1  ;;  %v3087_v38 = vpop.f32.mrf.mxu0 }
 0x10e   :  { %1515 = vst [vmem:[%s4968_s6 + $0x10] sm:$0xff] %v1451_v15  ;;  %2624 = vst [vmem:[%s4968_s6 + $0x210] sm:$0xff] %v2226_v34  ;;  %v1454_v20 = vadd.f32 %v2989_v13, %v745_v21  ;;  %v2229_v63 = vadd.f32 %v3087_v38, %v745_v21  ;;  %v746_v34 = vadd.f32 %v4000_v3, %v4098_v40 }
 0x10f   :  { %v1150_v10 = vpop.f32.mrf.mxu1  ;;  %v1925_v59 = vpop.f32.mrf.mxu0 }
 0x110   :  { %1518 = vst [vmem:[%s4968_s6 + $0x28] sm:$0xff] %v1454_v20  ;;  %2627 = vst [vmem:[%s4968_s6 + $0x228] sm:$0xff] %v2229_v63  ;;  %v1453_v25 = vadd.f32 %v1150_v10, %v744_v51  ;;  %v2228_v46 = vadd.f32 %v1925_v59, %v744_v51  ;;  %v749_v20 = vadd.f32 %v4000_v3, %v4112_v45 }
 0x111   :  { %v2992_v26 = vpop.f32.mrf.mxu1  ;;  %v3090_v5 = vpop.f32.mrf.mxu0  ;;  %v748_v59 = vadd.f32 %v4000_v3, %v4126_v50 }
 0x112   :  { %1517 = vst [vmem:[%s4968_s6 + $0x20] sm:$0xff] %v1453_v25  ;;  %2626 = vst [vmem:[%s4968_s6 + $0x220] sm:$0xff] %v2228_v46  ;;  %v1456_v30 = vadd.f32 %v2992_v26, %v747_v48  ;;  %v2231_v15 = vadd.f32 %v3090_v5, %v747_v48  ;;  %v751_v26 = vadd.f32 %v4000_v3, %v4140_v55 }
 0x113   :  { %v1160_v21 = vpop.f32.mrf.mxu1  ;;  %v1935_v13 = vpop.f32.mrf.mxu0 }
 0x114   :  { %1520 = vst [vmem:[%s4968_s6 + $0x38] sm:$0xff] %v1456_v30  ;;  %2629 = vst [vmem:[%s4968_s6 + $0x238] sm:$0xff] %v2231_v15  ;;  %v1455_v35 = vadd.f32 %v1160_v21, %v746_v34  ;;  %v2230_v38 = vadd.f32 %v1935_v13, %v746_v34  ;;  %v750_v34 = vadd.f32 %v4000_v3, %v4154_v60 }
 0x115   :  { %v2995_v63 = vpop.f32.mrf.mxu1  ;;  %v3093_v51 = vpop.f32.mrf.mxu0 }
 0x116   :  { %1519 = vst [vmem:[%s4968_s6 + $0x30] sm:$0xff] %v1455_v35  ;;  %2628 = vst [vmem:[%s4968_s6 + $0x230] sm:$0xff] %v2230_v38  ;;  %v1458_v40 = vadd.f32 %v2995_v63, %v749_v20  ;;  %v2233_v10 = vadd.f32 %v3093_v51, %v749_v20  ;;  %v753_v38 = vadd.f32 %v4000_v3, %v4168_v1 }
 0x117   :  { %v1170_v25 = vpop.f32.mrf.mxu1  ;;  %v1945_v46 = vpop.f32.mrf.mxu0 }
 0x118   :  { %1522 = vst [vmem:[%s4968_s6 + $0x48] sm:$0xff] %v1458_v40  ;;  %2631 = vst [vmem:[%s4968_s6 + $0x248] sm:$0xff] %v2233_v10  ;;  %v1457_v45 = vadd.f32 %v1170_v25, %v748_v59  ;;  %v2232_v48 = vadd.f32 %v1945_v46, %v748_v59  ;;  %v752_v40 = vadd.f32 %v4000_v3, %v4182_v8 }
 0x119   :  { %v2998_v5 = vpop.f32.mrf.mxu1  ;;  %v3096_v30 = vpop.f32.mrf.mxu0  ;;  %v755_v46 = vadd.f32 %v4000_v3, %v4196_v16 }
 0x11a   :  { %1521 = vst [vmem:[%s4968_s6 + $0x40] sm:$0xff] %v1457_v45  ;;  %2630 = vst [vmem:[%s4968_s6 + $0x240] sm:$0xff] %v2232_v48  ;;  %v1460_v50 = vadd.f32 %v2998_v5, %v751_v26  ;;  %v2235_v15 = vadd.f32 %v3096_v30, %v751_v26  ;;  %v754_v5 = vadd.f32 %v4000_v3, %v4210_v24 }
 0x11b   :  { %v1180_v21 = vpop.f32.mrf.mxu1  ;;  %v1955_v13 = vpop.f32.mrf.mxu0 }
 0x11c   :  { %1524 = vst [vmem:[%s4968_s6 + $0x58] sm:$0xff] %v1460_v50  ;;  %2633 = vst [vmem:[%s4968_s6 + $0x258] sm:$0xff] %v2235_v15  ;;  %v1459_v55 = vadd.f32 %v1180_v21, %v750_v34  ;;  %v2234_v35 = vadd.f32 %v1955_v13, %v750_v34  ;;  %v757_v34 = vadd.f32 %v4000_v3, %v4224_v33 }
 0x11d   :  { %v3001_v20 = vpop.f32.mrf.mxu1  ;;  %v3099_v63 = vpop.f32.mrf.mxu0 }
 0x11e   :  { %1523 = vst [vmem:[%s4968_s6 + $0x50] sm:$0xff] %v1459_v55  ;;  %2632 = vst [vmem:[%s4968_s6 + $0x250] sm:$0xff] %v2234_v35  ;;  %v1462_v60 = vadd.f32 %v3001_v20, %v753_v38  ;;  %v2237_v51 = vadd.f32 %v3099_v63, %v753_v38  ;;  %v756_v35 = vadd.f32 %v4000_v3, %v4238_v41 }
 0x11f   :  { %v1190_v10 = vpop.f32.mrf.mxu1  ;;  %v1965_v59 = vpop.f32.mrf.mxu0 }
 0x120   :  { %1526 = vst [vmem:[%s4968_s6 + $0x68] sm:$0xff] %v1462_v60  ;;  %2635 = vst [vmem:[%s4968_s6 + $0x268] sm:$0xff] %v2237_v51  ;;  %v1461_v1 = vadd.f32 %v1190_v10, %v752_v40  ;;  %v2236_v25 = vadd.f32 %v1965_v59, %v752_v40  ;;  %v759_v60 = vadd.f32 %v4000_v3, %v4252_v49 }
 0x121   :  { %v3004_v45 = vpop.f32.mrf.mxu1  ;;  %v3102_v48 = vpop.f32.mrf.mxu0  ;;  %v758_v59 = vadd.f32 %v4000_v3, %v4266_v58 }
 0x122   :  { %1525 = vst [vmem:[%s4968_s6 + $0x60] sm:$0xff] %v1461_v1  ;;  %2634 = vst [vmem:[%s4968_s6 + $0x260] sm:$0xff] %v2236_v25  ;;  %v1464_v8 = vadd.f32 %v3004_v45, %v755_v46  ;;  %v2239_v26 = vadd.f32 %v3102_v48, %v755_v46  ;;  %v761_v45 = vadd.f32 %v4000_v3, %v4280_v2 }
 0x123   :  { %v1200_v30 = vpop.f32.mrf.mxu1  ;;  %v1975_v50 = vpop.f32.mrf.mxu0 }
 0x124   :  { %1528 = vst [vmem:[%s4968_s6 + $0x78] sm:$0xff] %v1464_v8  ;;  %2637 = vst [vmem:[%s4968_s6 + $0x278] sm:$0xff] %v2239_v26  ;;  %v1463_v16 = vadd.f32 %v1200_v30, %v754_v5  ;;  %v2238_v15 = vadd.f32 %v1975_v50, %v754_v5  ;;  %v760_v5 = vadd.f32 %v4000_v3, %v4294_v14 }
 0x125   :  { %v3007_v21 = vpop.f32.mrf.mxu1  ;;  %v3105_v13 = vpop.f32.mrf.mxu0 }
 0x126   :  { %1527 = vst [vmem:[%s4968_s6 + $0x70] sm:$0xff] %v1463_v16  ;;  %2636 = vst [vmem:[%s4968_s6 + $0x270] sm:$0xff] %v2238_v15  ;;  %v1466_v24 = vadd.f32 %v3007_v21, %v757_v34  ;;  %v2241_v55 = vadd.f32 %v3105_v13, %v757_v34  ;;  %v763_v15 = vadd.f32 %v4000_v3, %v4308_v29 }
 0x127   :  { %v1210_v38 = vpop.f32.mrf.mxu1  ;;  %v1985_v20 = vpop.f32.mrf.mxu0 }
 0x128   :  { %1530 = vst [vmem:[%s4968_s6 + $0x88] sm:$0xff] %v1466_v24  ;;  %2639 = vst [vmem:[%s4968_s6 + $0x288] sm:$0xff] %v2241_v55  ;;  %v1465_v33 = vadd.f32 %v1210_v38, %v756_v35  ;;  %v2240_v63 = vadd.f32 %v1985_v20, %v756_v35  ;;  %v762_v24 = vadd.f32 %v4000_v3, %v4322_v43 }
 0x129   :  { %v3010_v51 = vpop.f32.mrf.mxu1  ;;  %v3108_v40 = vpop.f32.mrf.mxu0  ;;  %v765_v20 = vadd.f32 %v4000_v3, %v4336_v56 }
 0x12a   :  { %1529 = vst [vmem:[%s4968_s6 + $0x80] sm:$0xff] %v1465_v33  ;;  %2638 = vst [vmem:[%s4968_s6 + $0x280] sm:$0xff] %v2240_v63  ;;  %v1468_v41 = vadd.f32 %v3010_v51, %v759_v60  ;;  %v2243_v10 = vadd.f32 %v3108_v40, %v759_v60  ;;  %v764_v51 = vadd.f32 %v4000_v3, %v4350_v9 }
 0x12b   :  { %v1220_v1 = vpop.f32.mrf.mxu1  ;;  %v1995_v25 = vpop.f32.mrf.mxu0 }
 0x12c   :  { %1532 = vst [vmem:[%s4968_s6 + $0x98] sm:$0xff] %v1468_v41  ;;  %2641 = vst [vmem:[%s4968_s6 + $0x298] sm:$0xff] %v2243_v10  ;;  %v1467_v49 = vadd.f32 %v1220_v1, %v758_v59  ;;  %v2242_v46 = vadd.f32 %v1995_v25, %v758_v59  ;;  %v767_v59 = vadd.f32 %v4000_v3, %v4364_v31 }
 0x12d   :  { %v3013_v48 = vpop.f32.mrf.mxu1  ;;  %v3111_v8 = vpop.f32.mrf.mxu0 }
 0x12e   :  { %1531 = vst [vmem:[%s4968_s6 + $0x90] sm:$0xff] %v1467_v49  ;;  %2640 = vst [vmem:[%s4968_s6 + $0x290] sm:$0xff] %v2242_v46  ;;  %v1470_v58 = vadd.f32 %v3013_v48, %v761_v45  ;;  %v2245_v26 = vadd.f32 %v3111_v8, %v761_v45  ;;  %v766_v46 = vadd.f32 %v4000_v3, %v4378_v54 }
 0x12f   :  { %v1230_v30 = vpop.f32.mrf.mxu1  ;;  %v2005_v50 = vpop.f32.mrf.mxu0 }
 0x130   :  { %1534 = vst [vmem:[%s4968_s6 + $0xa8] sm:$0xff] %v1470_v58  ;;  %2643 = vst [vmem:[%s4968_s6 + $0x2a8] sm:$0xff] %v2245_v26  ;;  %v1469_v2 = vadd.f32 %v1230_v30, %v760_v5  ;;  %v2244_v16 = vadd.f32 %v2005_v50, %v760_v5  ;;  %v769_v58 = vadd.f32 %v4000_v3, %v4392_v23 }
 0x131   :  { %v3016_v34 = vpop.f32.mrf.mxu1  ;;  %v3114_v21 = vpop.f32.mrf.mxu0  ;;  %v768_v50 = vadd.f32 %v4000_v3, %v4406_v0 }
 0x132   :  { %1533 = vst [vmem:[%s4968_s6 + $0xa0] sm:$0xff] %v1469_v2  ;;  %2642 = vst [vmem:[%s4968_s6 + $0x2a0] sm:$0xff] %v2244_v16  ;;  %v1472_v14 = vadd.f32 %v3016_v34, %v763_v15  ;;  %v2247_v13 = vadd.f32 %v3114_v21, %v763_v15  ;;  %v771_v34 = vadd.f32 %v4000_v3, %v4420_v39 }
 0x133   :  { %v1240_v55 = vpop.f32.mrf.mxu1  ;;  %v2015_v35 = vpop.f32.mrf.mxu0 }
 0x134   :  { %1536 = vst [vmem:[%s4968_s6 + $0xb8] sm:$0xff] %v1472_v14  ;;  %2645 = vst [vmem:[%s4968_s6 + $0x2b8] sm:$0xff] %v2247_v13  ;;  %v1471_v29 = vadd.f32 %v1240_v55, %v762_v24  ;;  %v2246_v38 = vadd.f32 %v2015_v35, %v762_v24  ;;  %v770_v24 = vadd.f32 %v4000_v3, %v4434_v18 }
 0x135   :  { %v3019_v33 = vpop.f32.mrf.mxu1  ;;  %v3117_v63 = vpop.f32.mrf.mxu0 }
 0x136   :  { %1535 = vst [vmem:[%s4968_s6 + $0xb0] sm:$0xff] %v1471_v29  ;;  %2644 = vst [vmem:[%s4968_s6 + $0x2b0] sm:$0xff] %v2246_v38  ;;  %v1474_v43 = vadd.f32 %v3019_v33, %v765_v20  ;;  %v2249_v60 = vadd.f32 %v3117_v63, %v765_v20 }
 0x137   :  { %v1250_v40 = vpop.f32.mrf.mxu1  ;;  %v2025_v41 = vpop.f32.mrf.mxu0 }
 0x138   :  { %1538 = vst [vmem:[%s4968_s6 + $0xc8] sm:$0xff] %v1474_v43  ;;  %2647 = vst [vmem:[%s4968_s6 + $0x2c8] sm:$0xff] %v2249_v60  ;;  %v1473_v56 = vadd.f32 %v1250_v40, %v764_v51  ;;  %v2248_v10 = vadd.f32 %v2025_v41, %v764_v51 }
 0x139   :  { %v3022_v1 = vpop.f32.mrf.mxu1  ;;  %v3120_v25 = vpop.f32.mrf.mxu0 }
 0x13a   :  { %1537 = vst [vmem:[%s4968_s6 + $0xc0] sm:$0xff] %v1473_v56  ;;  %2646 = vst [vmem:[%s4968_s6 + $0x2c0] sm:$0xff] %v2248_v10  ;;  %v1476_v9 = vadd.f32 %v3022_v1, %v767_v59  ;;  %v2251_v49 = vadd.f32 %v3120_v25, %v767_v59 }
 0x13b   :  { %v1260_v45 = vpop.f32.mrf.mxu1  ;;  %v2035_v48 = vpop.f32.mrf.mxu0 }
 0x13c   :  { %1540 = vst [vmem:[%s4968_s6 + $0xd8] sm:$0xff] %v1476_v9  ;;  %2649 = vst [vmem:[%s4968_s6 + $0x2d8] sm:$0xff] %v2251_v49  ;;  %v1475_v31 = vadd.f32 %v1260_v45, %v766_v46  ;;  %v2250_v8 = vadd.f32 %v2035_v48, %v766_v46 }
 0x13d   :  { %v3025_v26 = vpop.f32.mrf.mxu1  ;;  %v3123_v5 = vpop.f32.mrf.mxu0 }
 0x13e   :  { %1539 = vst [vmem:[%s4968_s6 + $0xd0] sm:$0xff] %v1475_v31  ;;  %2648 = vst [vmem:[%s4968_s6 + $0x2d0] sm:$0xff] %v2250_v8  ;;  %v1478_v54 = vadd.f32 %v3025_v26, %v769_v58  ;;  %v2253_v30 = vadd.f32 %v3123_v5, %v769_v58 }
 0x13f   :  { %v1270_v2 = vpop.f32.mrf.mxu1  ;;  %v2045_v16 = vpop.f32.mrf.mxu0 }
 0x140   :  { %1542 = vst [vmem:[%s4968_s6 + $0xe8] sm:$0xff] %v1478_v54  ;;  %2651 = vst [vmem:[%s4968_s6 + $0x2e8] sm:$0xff] %v2253_v30  ;;  %v1477_v23 = vadd.f32 %v1270_v2, %v768_v50  ;;  %v2252_v15 = vadd.f32 %v2045_v16, %v768_v50 }
 0x141   :  { %v3028_v21 = vpop.f32.mrf.mxu1  ;;  %v3126_v14 = vpop.f32.mrf.mxu0 }
 0x142   :  { %1541 = vst [vmem:[%s4968_s6 + $0xe0] sm:$0xff] %v1477_v23  ;;  %2650 = vst [vmem:[%s4968_s6 + $0x2e0] sm:$0xff] %v2252_v15  ;;  %v1480_v0 = vadd.f32 %v3028_v21, %v771_v34  ;;  %v2255_v13 = vadd.f32 %v3126_v14, %v771_v34 }
 0x143   :  { %v1280_v55 = vpop.f32.mrf.mxu1  ;;  %v2055_v35 = vpop.f32.mrf.mxu0 }
 0x144   :  { %1544 = vst [vmem:[%s4968_s6 + $0xf8] sm:$0xff] %v1480_v0  ;;  %2653 = vst [vmem:[%s4968_s6 + $0x2f8] sm:$0xff] %v2255_v13  ;;  %v1479_v39 = vadd.f32 %v1280_v55, %v770_v24  ;;  %v2254_v29 = vadd.f32 %v2055_v35, %v770_v24 }
 0x145   :  { %v3031_v38 = vpop.f32.mrf.mxu1  ;;  %v3129_v20 = vpop.f32.mrf.mxu0 }
 0x146   :  { %1543 = vst [vmem:[%s4968_s6 + $0xf0] sm:$0xff] %v1479_v39  ;;  %2652 = vst [vmem:[%s4968_s6 + $0x2f0] sm:$0xff] %v2254_v29  ;;  %v1482_v3 = vadd.f32 %v3031_v38, %v4018_v12  ;;  %v2257_v18 = vadd.f32 %v3129_v20, %v4018_v12 }
 0x147   :  { %v1290_v33 = vpop.f32.mrf.mxu1  ;;  %v2065_v63 = vpop.f32.mrf.mxu0 }
 0x148   :  { %1546 = vst [vmem:[%s4968_s6 + $0x108] sm:$0xff] %v1482_v3  ;;  %2655 = vst [vmem:[%s4968_s6 + $0x308] sm:$0xff] %v2257_v18  ;;  %v1481_v43 = vadd.f32 %v1290_v33, %v4032_v17  ;;  %v2256_v60 = vadd.f32 %v2065_v63, %v4032_v17 }
 0x149   :  { %v3034_v51 = vpop.f32.mrf.mxu1  ;;  %v3132_v40 = vpop.f32.mrf.mxu0 }
 0x14a   :  { %1545 = vst [vmem:[%s4968_s6 + $0x100] sm:$0xff] %v1481_v43  ;;  %2654 = vst [vmem:[%s4968_s6 + $0x300] sm:$0xff] %v2256_v60  ;;  %v1484_v12 = vadd.f32 %v3034_v51, %v4046_v22  ;;  %v2259_v41 = vadd.f32 %v3132_v40, %v4046_v22 }
 0x14b   :  { %v1300_v56 = vpop.f32.mrf.mxu1  ;;  %v2075_v10 = vpop.f32.mrf.mxu0 }
 0x14c   :  { %1548 = vst [vmem:[%s4968_s6 + $0x118] sm:$0xff] %v1484_v12  ;;  %2657 = vst [vmem:[%s4968_s6 + $0x318] sm:$0xff] %v2259_v41  ;;  %v1483_v17 = vadd.f32 %v1300_v56, %v4060_v27  ;;  %v2258_v59 = vadd.f32 %v2075_v10, %v4060_v27 }
 0x14d   :  { %v3037_v1 = vpop.f32.mrf.mxu1  ;;  %v3135_v25 = vpop.f32.mrf.mxu0 }
 0x14e   :  { %1547 = vst [vmem:[%s4968_s6 + $0x110] sm:$0xff] %v1483_v17  ;;  %2656 = vst [vmem:[%s4968_s6 + $0x310] sm:$0xff] %v2258_v59  ;;  %v1486_v22 = vadd.f32 %v3037_v1, %v4074_v32  ;;  %v2261_v9 = vadd.f32 %v3135_v25, %v4074_v32 }
 0x14f   :  { %v1310_v49 = vpop.f32.mrf.mxu1  ;;  %v2085_v46 = vpop.f32.mrf.mxu0 }
 0x150   :  { %1550 = vst [vmem:[%s4968_s6 + $0x128] sm:$0xff] %v1486_v22  ;;  %2659 = vst [vmem:[%s4968_s6 + $0x328] sm:$0xff] %v2261_v9  ;;  %v1485_v27 = vadd.f32 %v1310_v49, %v4088_v37  ;;  %v2260_v45 = vadd.f32 %v2085_v46, %v4088_v37 }
 0x151   :  { %v3040_v48 = vpop.f32.mrf.mxu1  ;;  %v3138_v31 = vpop.f32.mrf.mxu0 }
 0x152   :  { %1549 = vst [vmem:[%s4968_s6 + $0x120] sm:$0xff] %v1485_v27  ;;  %2658 = vst [vmem:[%s4968_s6 + $0x320] sm:$0xff] %v2260_v45  ;;  %v1488_v32 = vadd.f32 %v3040_v48, %v4102_v42  ;;  %v2263_v8 = vadd.f32 %v3138_v31, %v4102_v42 }
 0x153   :  { %v1320_v58 = vpop.f32.mrf.mxu1  ;;  %v2095_v26 = vpop.f32.mrf.mxu0 }
 0x154   :  { %1552 = vst [vmem:[%s4968_s6 + $0x138] sm:$0xff] %v1488_v32  ;;  %2661 = vst [vmem:[%s4968_s6 + $0x338] sm:$0xff] %v2263_v8  ;;  %v1487_v37 = vadd.f32 %v1320_v58, %v4116_v47  ;;  %v2262_v5 = vadd.f32 %v2095_v26, %v4116_v47  ;;  %v4993_v26 = vld [vmem:[#allocation4_spill] sm:$0xff] }
 0x155   :  { %v3043_v54 = vpop.f32.mrf.mxu1  ;;  %v3141_v30 = vpop.f32.mrf.mxu0 }
 0x156   :  { %1551 = vst [vmem:[%s4968_s6 + $0x130] sm:$0xff] %v1487_v37  ;;  %2660 = vst [vmem:[%s4968_s6 + $0x330] sm:$0xff] %v2262_v5  ;;  %v1490_v42 = vadd.f32 %v3043_v54, %v4130_v52  ;;  %v2265_v50 = vadd.f32 %v3141_v30, %v4130_v52 }
 0x157   :  { %v1330_v2 = vpop.f32.mrf.mxu1  ;;  %v2105_v16 = vpop.f32.mrf.mxu0 }
 0x158   :  { %1554 = vst [vmem:[%s4968_s6 + $0x148] sm:$0xff] %v1490_v42  ;;  %2663 = vst [vmem:[%s4968_s6 + $0x348] sm:$0xff] %v2265_v50  ;;  %v1489_v47 = vadd.f32 %v1330_v2, %v4144_v57  ;;  %v2264_v23 = vadd.f32 %v2105_v16, %v4144_v57  ;;  %v4994_v42 = vld [vmem:[#allocation5_spill] sm:$0xff] }
 0x159   :  { %v3046_v15 = vpop.f32.mrf.mxu1  ;;  %v3144_v34 = vpop.f32.mrf.mxu0 }
 0x15a   :  { %1553 = vst [vmem:[%s4968_s6 + $0x140] sm:$0xff] %v1489_v47  ;;  %2662 = vst [vmem:[%s4968_s6 + $0x340] sm:$0xff] %v2264_v23  ;;  %v1492_v52 = vadd.f32 %v3046_v15, %v4158_v62  ;;  %v2267_v21 = vadd.f32 %v3144_v34, %v4158_v62  ;;  %v4995_v23 = vld [vmem:[#allocation6_spill] sm:$0xff] }
 0x15b   :  { %v1340_v14 = vpop.f32.mrf.mxu1  ;;  %v2115_v0 = vpop.f32.mrf.mxu0 }
 0x15c   :  { %1556 = vst [vmem:[%s4968_s6 + $0x158] sm:$0xff] %v1492_v52  ;;  %2665 = vst [vmem:[%s4968_s6 + $0x358] sm:$0xff] %v2267_v21  ;;  %v1491_v57 = vadd.f32 %v1340_v14, %v4172_v4  ;;  %v2266_v13 = vadd.f32 %v2115_v0, %v4172_v4  ;;  %v4996_v14 = vld [vmem:[#allocation7_spill] sm:$0xff] }
 0x15d   :  { %v3049_v24 = vpop.f32.mrf.mxu1  ;;  %v3147_v55 = vpop.f32.mrf.mxu0 }
 0x15e   :  { %1555 = vst [vmem:[%s4968_s6 + $0x150] sm:$0xff] %v1491_v57  ;;  %2664 = vst [vmem:[%s4968_s6 + $0x350] sm:$0xff] %v2266_v13  ;;  %v1494_v62 = vadd.f32 %v3049_v24, %v4186_v11  ;;  %v2269_v35 = vadd.f32 %v3147_v55, %v4186_v11  ;;  %v4997_v55 = vld [vmem:[#allocation8_spill] sm:$0xff] }
 0x15f   :  { %v1350_v39 = vpop.f32.mrf.mxu1  ;;  %v2125_v29 = vpop.f32.mrf.mxu0 }
 0x160   :  { %1558 = vst [vmem:[%s4968_s6 + $0x168] sm:$0xff] %v1494_v62  ;;  %2667 = vst [vmem:[%s4968_s6 + $0x368] sm:$0xff] %v2269_v35  ;;  %v1493_v4 = vadd.f32 %v1350_v39, %v4200_v19  ;;  %v2268_v38 = vadd.f32 %v2125_v29, %v4200_v19 }
 0x161   :  { %v3052_v20 = vpop.f32.mrf.mxu1  ;;  %v3150_v3 = vpop.f32.mrf.mxu0 }
 0x162   :  { %1557 = vst [vmem:[%s4968_s6 + $0x160] sm:$0xff] %v1493_v4  ;;  %2666 = vst [vmem:[%s4968_s6 + $0x360] sm:$0xff] %v2268_v38  ;;  %v1496_v11 = vadd.f32 %v3052_v20, %v4214_v28  ;;  %v2271_v18 = vadd.f32 %v3150_v3, %v4214_v28  ;;  %v4998_v4 = vld [vmem:[#allocation9_spill] sm:$0xff] }
 0x163   :  { %v1360_v33 = vpop.f32.mrf.mxu1  ;;  %v2135_v63 = vpop.f32.mrf.mxu0 }
 0x164   :  { %1560 = vst [vmem:[%s4968_s6 + $0x178] sm:$0xff] %v1496_v11  ;;  %2669 = vst [vmem:[%s4968_s6 + $0x378] sm:$0xff] %v2271_v18  ;;  %v1495_v19 = vadd.f32 %v1360_v33, %v4228_v36  ;;  %v2270_v43 = vadd.f32 %v2135_v63, %v4228_v36  ;;  %v4999_v18 = vld [vmem:[#allocation10_spill] sm:$0xff] }
 0x165   :  { %v3055_v60 = vpop.f32.mrf.mxu1  ;;  %v3153_v51 = vpop.f32.mrf.mxu0 }
 0x166   :  { %1559 = vst [vmem:[%s4968_s6 + $0x170] sm:$0xff] %v1495_v19  ;;  %2668 = vst [vmem:[%s4968_s6 + $0x370] sm:$0xff] %v2270_v43  ;;  %v1498_v28 = vadd.f32 %v3055_v60, %v4242_v44  ;;  %v2273_v40 = vadd.f32 %v3153_v51, %v4242_v44  ;;  %v5000_v60 = vld [vmem:[#allocation11_spill] sm:$0xff] }
 0x167   :  { %v1370_v12 = vpop.f32.mrf.mxu1  ;;  %v2145_v41 = vpop.f32.mrf.mxu0 }
 0x168   :  { %1562 = vst [vmem:[%s4968_s6 + $0x188] sm:$0xff] %v1498_v28  ;;  %2671 = vst [vmem:[%s4968_s6 + $0x388] sm:$0xff] %v2273_v40  ;;  %v1497_v36 = vadd.f32 %v1370_v12, %v4256_v53  ;;  %v2272_v56 = vadd.f32 %v2145_v41, %v4256_v53  ;;  %v5001_v41 = vld [vmem:[#allocation12_spill] sm:$0xff] }
 0x169   :  { %v3058_v10 = vpop.f32.mrf.mxu1  ;;  %v3156_v17 = vpop.f32.mrf.mxu0 }
 0x16a   :  { %1561 = vst [vmem:[%s4968_s6 + $0x180] sm:$0xff] %v1497_v36  ;;  %2670 = vst [vmem:[%s4968_s6 + $0x380] sm:$0xff] %v2272_v56  ;;  %v1500_v44 = vadd.f32 %v3058_v10, %v4270_v61  ;;  %v2275_v59 = vadd.f32 %v3156_v17, %v4270_v61  ;;  %v4991_v61 = vld [vmem:[#allocation2_spill] sm:$0xff] }
 0x16b   :  { %v1380_v1 = vpop.f32.mrf.mxu1  ;;  %v2155_v25 = vpop.f32.mrf.mxu0 }
 0x16c   :  { %1564 = vst [vmem:[%s4968_s6 + $0x198] sm:$0xff] %v1500_v44  ;;  %2673 = vst [vmem:[%s4968_s6 + $0x398] sm:$0xff] %v2275_v59  ;;  %v1499_v53 = vadd.f32 %v1380_v1, %v4284_v7  ;;  %v2274_v22 = vadd.f32 %v2155_v25, %v4284_v7  ;;  %v4992_v7 = vld [vmem:[#allocation3_spill] sm:$0xff] }
 0x16d   :  { %v3061_v9 = vpop.f32.mrf.mxu1  ;;  %v3159_v49 = vpop.f32.mrf.mxu0 }
 0x16e   :  { %1563 = vst [vmem:[%s4968_s6 + $0x190] sm:$0xff] %v1499_v53  ;;  %2672 = vst [vmem:[%s4968_s6 + $0x390] sm:$0xff] %v2274_v22  ;;  %v1502_v46 = vadd.f32 %v3061_v9, %v4991_v61  ;;  %v2277_v27 = vadd.f32 %v3159_v49, %v4991_v61 }
 0x16f   :  { %v1390_v45 = vpop.f32.mrf.mxu1  ;;  %v2165_v48 = vpop.f32.mrf.mxu0 }
 0x170   :  { %1566 = vst [vmem:[%s4968_s6 + $0x1a8] sm:$0xff] %v1502_v46  ;;  %2675 = vst [vmem:[%s4968_s6 + $0x3a8] sm:$0xff] %v2277_v27  ;;  %v1501_v31 = vadd.f32 %v1390_v45, %v4992_v7  ;;  %v2276_v32 = vadd.f32 %v2165_v48, %v4992_v7 }
 0x171   :  { %v3064_v8 = vpop.f32.mrf.mxu1  ;;  %v3162_v58 = vpop.f32.mrf.mxu0 }
 0x172   :  { %1565 = vst [vmem:[%s4968_s6 + $0x1a0] sm:$0xff] %v1501_v31  ;;  %2674 = vst [vmem:[%s4968_s6 + $0x3a0] sm:$0xff] %v2276_v32  ;;  %v1504_v37 = vadd.f32 %v3064_v8, %v4993_v26  ;;  %v2279_v5 = vadd.f32 %v3162_v58, %v4993_v26 }
 0x173   :  { %v1400_v54 = vpop.f32.mrf.mxu1  ;;  %v2175_v30 = vpop.f32.mrf.mxu0 }
 0x174   :  { %1568 = vst [vmem:[%s4968_s6 + $0x1b8] sm:$0xff] %v1504_v37  ;;  %2677 = vst [vmem:[%s4968_s6 + $0x3b8] sm:$0xff] %v2279_v5  ;;  %v1503_v50 = vadd.f32 %v1400_v54, %v4994_v42  ;;  %v2278_v2 = vadd.f32 %v2175_v30, %v4994_v42 }
 0x175   :  { %v3067_v16 = vpop.f32.mrf.mxu1  ;;  %v3165_v47 = vpop.f32.mrf.mxu0 }
 0x176   :  { %1567 = vst [vmem:[%s4968_s6 + $0x1b0] sm:$0xff] %v1503_v50  ;;  %2676 = vst [vmem:[%s4968_s6 + $0x3b0] sm:$0xff] %v2278_v2  ;;  %v1506_v15 = vadd.f32 %v3067_v16, %v4995_v23  ;;  %v2281_v34 = vadd.f32 %v3165_v47, %v4995_v23 }
 0x177   :  { %v1410_v52 = vpop.f32.mrf.mxu1  ;;  %v2185_v21 = vpop.f32.mrf.mxu0 }
 0x178   :  { %1570 = vst [vmem:[%s4968_s6 + $0x1c8] sm:$0xff] %v1506_v15  ;;  %2679 = vst [vmem:[%s4968_s6 + $0x3c8] sm:$0xff] %v2281_v34  ;;  %v1505_v0 = vadd.f32 %v1410_v52, %v4996_v14  ;;  %v2280_v57 = vadd.f32 %v2185_v21, %v4996_v14 }
 0x179   :  { %v3070_v13 = vpop.f32.mrf.mxu1  ;;  %v3168_v24 = vpop.f32.mrf.mxu0 }
 0x17a   :  { %1569 = vst [vmem:[%s4968_s6 + $0x1c0] sm:$0xff] %v1505_v0  ;;  %2678 = vst [vmem:[%s4968_s6 + $0x3c0] sm:$0xff] %v2280_v57  ;;  %v1508_v62 = vadd.f32 %v3070_v13, %v4997_v55  ;;  %v2283_v35 = vadd.f32 %v3168_v24, %v4997_v55 }
 0x17b   :  { %v1420_v39 = vpop.f32.mrf.mxu1  ;;  %v2195_v29 = vpop.f32.mrf.mxu0 }
 0x17c   :  { %1572 = vst [vmem:[%s4968_s6 + $0x1d8] sm:$0xff] %v1508_v62  ;;  %2681 = vst [vmem:[%s4968_s6 + $0x3d8] sm:$0xff] %v2283_v35  ;;  %v1507_v38 = vadd.f32 %v1420_v39, %v4998_v4  ;;  %v2282_v20 = vadd.f32 %v2195_v29, %v4998_v4 }
 0x17d   :  { %v3073_v3 = vpop.f32.mrf.mxu1  ;;  %v3171_v11 = vpop.f32.mrf.mxu0 }
 0x17e   :  { %1571 = vst [vmem:[%s4968_s6 + $0x1d0] sm:$0xff] %v1507_v38  ;;  %2680 = vst [vmem:[%s4968_s6 + $0x3d0] sm:$0xff] %v2282_v20  ;;  %v1510_v33 = vadd.f32 %v3073_v3, %v4999_v18  ;;  %v2285_v63 = vadd.f32 %v3171_v11, %v4999_v18 }
 0x17f   :  { %v1430_v19 = vpop.f32.mrf.mxu1  ;;  %v2205_v43 = vpop.f32.mrf.mxu0 }
 0x180   :  { %1574 = vst [vmem:[%s4968_s6 + $0x1e8] sm:$0xff] %v1510_v33  ;;  %2683 = vst [vmem:[%s4968_s6 + $0x3e8] sm:$0xff] %v2285_v63  ;;  %v1509_v51 = vadd.f32 %v1430_v19, %v5000_v60  ;;  %v2284_v28 = vadd.f32 %v2205_v43, %v5000_v60 }
 0x181   :  { %v3076_v40 = vpop.f32.mrf.mxu1  ;;  %v3174_v12 = vpop.f32.mrf.mxu0 }
 0x182   :  { %1573 = vst [vmem:[%s4968_s6 + $0x1e0] sm:$0xff] %v1509_v51  ;;  %2682 = vst [vmem:[%s4968_s6 + $0x3e0] sm:$0xff] %v2284_v28  ;;  %v1512_v36 = vadd.f32 %v3076_v40, %v5001_v41  ;;  %v2287_v56 = vadd.f32 %v3174_v12, %v5001_v41 }
 0x183   :  { %v1440_v10 = vpop.f32.mrf.mxu1  ;;  %v2215_v17 = vpop.f32.mrf.mxu0 }
 0x184   :  { %1576 = vst [vmem:[%s4968_s6 + $0x1f8] sm:$0xff] %v1512_v36  ;;  %2685 = vst [vmem:[%s4968_s6 + $0x3f8] sm:$0xff] %v2287_v56  ;;  %v1511_v44 = vadd.f32 %v1440_v10, %v4452_v6  ;;  %v2286_v59 = vadd.f32 %v2215_v17, %v4452_v6 }
 0x186   :  { %1575 = vst [vmem:[%s4968_s6 + $0x1f0] sm:$0xff] %v1511_v44  ;;  %2684 = vst [vmem:[%s4968_s6 + $0x3f0] sm:$0xff] %v2286_v59 }

</bundles_post_ra>
